<compile_context>
chip_gen: v6e
topology: v6e:2x2x1
jax: 0.10.0
libtpu: 0.0.40
codegen_flags: <defaults>
</compile_context>

<pallas_src>
import jax
import jax.numpy as jnp
from jax.experimental import pallas as pl
from jax.experimental.pallas import tpu as pltpu

# ---- small, module-consistent hyper-parameters ----
BATCH = 8              # >= 8 so f32 sublanes are fully used (perf review item)
FEATURE_SIZE = 32      # feature_size
PROJECTED = 16         # projected_size
MID = 8                # mid_size (BoundaryDetector s_features)
HIDDEN = 16            # hidden_size
MAX_FRAMES = 6
MAX_WORDS = 5
VOCAB = 20
START_ID = 1           # vocab('<start>')

# Raw (torch-equivalent) parameter names produced by _init_params.
RAW_PARAM_NAMES = (
    "w_fe", "b_fe",                      # frame_embed Linear(F, P)
    "w_si", "w_sh", "b_s", "vs",         # BoundaryDetector
    "w1_ih", "w1_hh", "b1",              # lstm1_cell (bias = b_ih + b_hh)
    "w2_ih", "w2_hh",                    # lstm2_cell (bias=False)
    "embed",                             # word_embed Embedding(V, P)
    "w_v2m", "b_v2m",                    # v2m Linear(H, P)
    "w_w2m", "b_w2m",                    # w2m Linear(P, P)
    "wg_ih", "wg_hh", "bg_ih", "bg_hh",  # gru_cell
    "w_rest", "b_rest",                  # word_restore Linear(H, V)
)

# Fused parameters actually fed to the kernel.
PACKED_NAMES = (
    "w_enc1x", "b_enc1", "w_enc1h",      # frame_embed + LSTM1-ih + BD folded (x side / h side)
    "w_enc2",                            # LSTM2 [ih; hh]
    "w_v2g", "b_gi", "embed_g", "start_g",   # decoder GRU-input folds
    "w_hout", "b_hout",                  # [wg_hh | word_restore] fused on gru_h
)


def _dot(a, b):
    return jnp.dot(a, b, preferred_element_type=jnp.float32)


def _pack_params(p):
    """Host-side exact weight fusion (linear-only folds; eval dropout = identity)."""
    # BoundaryDetector folded through its (linear) output projection vs:
    #   zz = sigmoid(x @ (w_si @ vs) + h @ (w_sh @ vs) + b_s @ vs)
    w_siv = p["w_si"] @ p["vs"]                               # [P, 1]
    w_shv = p["w_sh"] @ p["vs"]                               # [H, 1]
    b_sv = p["b_s"] @ p["vs"]                                 # [1, 1]
    # LSTM1 and BD share (x, h1): one gate matrix with an extra BD column.
    a_x = jnp.concatenate([p["w1_ih"], w_siv], axis=1)        # [P, 4H+1]
    a_h = jnp.concatenate([p["w1_hh"], w_shv], axis=1)        # [H, 4H+1]
    b_g = jnp.concatenate([p["b1"], b_sv], axis=1)            # [1, 4H+1]
    packed = {
        # fold frame_embed into the x side of the fused LSTM1/BD matrix
        "w_enc1x": p["w_fe"] @ a_x,                           # [F, 4H+1]
        "b_enc1": p["b_fe"] @ a_x + b_g,                      # [1, 4H+1]
        "w_enc1h": a_h,                                       # [H, 4H+1]
        "w_enc2": jnp.concatenate([p["w2_ih"], p["w2_hh"]], axis=0),   # [2H, 4H]
        # decoder: fold v2m / w2m / embedding through the GRU input projection
        "w_v2g": p["w_v2m"] @ p["wg_ih"],                     # [H, 3H]
        "b_gi": (p["b_v2m"] + p["b_w2m"]) @ p["wg_ih"] + p["bg_ih"],   # [1, 3H]
        "embed_g": p["embed"] @ (p["w_w2m"] @ p["wg_ih"]),    # [V, 3H]
        # wg_hh fused with word_restore (both consume gru_h)
        "w_hout": jnp.concatenate([p["wg_hh"], p["w_rest"]], axis=1),  # [H, 3H+V]
        "b_hout": jnp.concatenate([p["bg_hh"], p["b_rest"]], axis=1),  # [1, 3H+V]
    }
    packed["start_g"] = packed["embed_g"][START_ID:START_ID + 1, :]    # [1, 3H]
    return packed


def _banet_kernel(videos_ref, *refs):
    n = len(PACKED_NAMES)
    p = {name: r[...] for name, r in zip(PACKED_NAMES, refs[:n])}
    words_ref, enc_ref = refs[n], refs[n + 1]

    f32 = jnp.float32
    H = HIDDEN
    videos = videos_ref[...]                    # [T, B, F] (time-major)
    T, B, F = videos.shape

    # ---------------- Encoder ----------------
    # frame_embed + LSTM1-input + BoundaryDetector x-contribution for ALL frames in one
    # matmul, hoisted off the recurrent chain.  [T*B, F] @ [F, 4H+1]
    pre = _dot(videos.reshape(T * B, F), p["w_enc1x"]) + p["b_enc1"]
    pre = pre.reshape(T, B, 4 * H + 1)

    h1 = jnp.zeros((B, H), f32)
    c1 = jnp.zeros((B, H), f32)
    h2 = jnp.zeros((B, H), f32)
    c2 = jnp.zeros((B, H), f32)

    for t in range(MAX_FRAMES):                 # tiny trip count -> keep unrolled
        # one h1-dependent matmul per frame: LSTM1 gates + BD logit in one push
        g1 = pre[t] + _dot(h1, p["w_enc1h"])                   # [B, 4H+1]
        sg = jax.nn.sigmoid(g1)                                # full-vreg activations
        th = jnp.tanh(g1)
        # BinaryGate (eval, threshold 0.5, strict >) on sigmoid(z @ vs)
        s = (sg[:, 4 * H:4 * H + 1] > 0.5).astype(f32)         # [B, 1]
        # LSTM1 (gate order i, f, g, o)
        c1n = sg[:, H:2 * H] * c1 + sg[:, :H] * th[:, 2 * H:3 * H]
        h1n = sg[:, 3 * H:4 * H] * jnp.tanh(c1n)
        # LSTM2 (bias=False), fused ih/hh weights
        g2 = _dot(jnp.concatenate([h1n * s, h2], axis=-1), p["w_enc2"])   # [B, 4H]
        sg2 = jax.nn.sigmoid(g2)
        th2 = jnp.tanh(g2)
        c2 = sg2[:, H:2 * H] * c2 + sg2[:, :H] * th2[:, 2 * H:3 * H]
        h2 = sg2[:, 3 * H:4 * H] * jnp.tanh(c2)
        h1 = h1n * (1.0 - s)
        c1 = c1n * (1.0 - s)

    encoded = h2                                               # [B, H]
    enc_ref[...] = encoded

    # ---------------- Decoder (infer / sample path) ----------------
    GH = 3 * H
    # loop invariants, hoisted: gi_base = (vm + b_w2m) @ wg_ih + bg_ih
    gi_base = _dot(encoded, p["w_v2g"]) + p["b_gi"]            # [B, 3H]
    word_g = jnp.broadcast_to(p["start_g"], (B, GH))           # <start> word, pre-projected
    gh = jnp.broadcast_to(p["b_hout"][:, :GH], (B, GH))        # gru_h0 = 0 -> gh0 = bg_hh
    gru_h = jnp.zeros((B, H), f32)

    col_v = jax.lax.broadcasted_iota(jnp.int32, (B, VOCAB), 1)
    col_f = jax.lax.broadcasted_iota(jnp.int32, (B, GH + VOCAB), 1)
    col_w = jax.lax.broadcasted_iota(jnp.int32, (B, MAX_WORDS), 1)
    words_acc = jnp.zeros((B, MAX_WORDS), jnp.int32)

    for j in range(MAX_WORDS):
        # GRU cell (gate order r, z, n); gi/gh already projected
        gi = gi_base + word_g
        sg = jax.nn.sigmoid(gi + gh)
        r = sg[:, :H]
        z = sg[:, H:2 * H]
        ng = jnp.tanh(gi[:, 2 * H:] + r * gh[:, 2 * H:])
        gru_h = (1.0 - z) * ng + z * gru_h
        # fused [wg_hh | word_restore] matmul: next-step gh + this-step logits
        fused = _dot(gru_h, p["w_hout"]) + p["b_hout"]         # [B, 3H + V]
        gh = fused[:, :GH]
        # argmax over the logits columns (>= 3H); lowest index wins ties (torch .max(1)[1])
        logits_masked = jnp.where(col_f >= GH, fused, -jnp.inf)
        mx = jnp.max(logits_masked, axis=-1, keepdims=True)
        ids = jnp.min(jnp.where(logits_masked >= mx, col_f - GH, VOCAB),
                      axis=-1, keepdims=True)                  # [B, 1] int32
        words_acc = jnp.where(col_w == j, ids, words_acc)      # accumulate in-vreg
        # next-word embedding already folded through w2m/wg_ih (one matmul)
        onehot = (col_v == ids).astype(f32)                    # [B, V]
        word_g = _dot(onehot, p["embed_g"])                    # [B, 3H]

    words_ref[...] = words_acc                                 # single lane-dense store


def banet_pallas(videos, params):
    B = videos.shape[0]
    packed = _pack_params(params)                    # host-side exact weight fusion
    videos_t = jnp.transpose(videos, (1, 0, 2))      # time-major [T, B, F] (layout plumbing)

    vmem_spec = pl.BlockSpec(memory_space=pltpu.MemorySpace.VMEM)   # whole arrays in VMEM
    n_in = 1 + len(PACKED_NAMES)
    out_shape = (
        jax.ShapeDtypeStruct((B, MAX_WORDS), jnp.int32),   # decoder word ids (infer mode)
        jax.ShapeDtypeStruct((B, HIDDEN), jnp.float32),    # video_encoded
    )
    fn = pl.pallas_call(
        _banet_kernel,
        out_shape=out_shape,
        in_specs=[vmem_spec] * n_in,
        out_specs=(vmem_spec, vmem_spec),
    )
    args = [videos_t] + [packed[name] for name in PACKED_NAMES]
    return fn(*args)


def _init_params(key):
    """Deterministic init mirroring the PyTorch __init__ shapes / distributions."""
    def uni(k, shape, bound):
        return jax.random.uniform(k, shape, jnp.float32, -bound, bound)

    keys = iter(jax.random.split(key, 32))
    F, P, S, H, V = FEATURE_SIZE, PROJECTED, MID, HIDDEN, VOCAB
    p = {}
    bF, bP, bH = 1.0 / (F ** 0.5), 1.0 / (P ** 0.5), 1.0 / (H ** 0.5)
    # Encoder
    p["w_fe"] = uni(next(keys), (F, P), bF)
    p["b_fe"] = uni(next(keys), (1, P), bF)
    p["w_si"] = uni(next(keys), (P, S), bP)     # BoundaryDetector (stdv = 1/sqrt(i_features))
    p["w_sh"] = uni(next(keys), (H, S), bP)
    p["b_s"] = uni(next(keys), (1, S), bP)
    p["vs"] = uni(next(keys), (S, 1), bP)
    p["w1_ih"] = uni(next(keys), (P, 4 * H), bH)
    p["w1_hh"] = uni(next(keys), (H, 4 * H), bH)
    p["b1"] = uni(next(keys), (1, 4 * H), bH) + uni(next(keys), (1, 4 * H), bH)  # b_ih + b_hh
    p["w2_ih"] = uni(next(keys), (H, 4 * H), bH)
    p["w2_hh"] = uni(next(keys), (H, 4 * H), bH)
    # Decoder
    p["embed"] = jax.random.normal(next(keys), (V, P), jnp.float32)
    p["w_v2m"] = uni(next(keys), (H, P), bH)
    p["b_v2m"] = uni(next(keys), (1, P), bH)
    p["w_w2m"] = uni(next(keys), (P, P), bP)
    p["b_w2m"] = uni(next(keys), (1, P), bP)
    p["wg_ih"] = uni(next(keys), (P, 3 * H), bH)
    p["wg_hh"] = uni(next(keys), (H, 3 * H), bH)
    p["bg_ih"] = uni(next(keys), (1, 3 * H), bH)
    p["bg_hh"] = uni(next(keys), (1, 3 * H), bH)
    p["w_rest"] = uni(next(keys), (H, V), bH)
    p["b_rest"] = uni(next(keys), (1, V), bH)
    return p


if __name__ == "__main__":
    root = jax.random.PRNGKey(0)
    k_params, k_vid = jax.random.split(root)
    params = _init_params(k_params)
    videos = jax.random.normal(k_vid, (BATCH, MAX_FRAMES, FEATURE_SIZE), jnp.float32)

    words, encoded = jax.jit(banet_pallas)(videos, params)
    words = jax.block_until_ready(words)
    encoded = jax.block_until_ready(encoded)

    assert words.shape == (BATCH, MAX_WORDS) and words.dtype == jnp.int32
    assert encoded.shape == (BATCH, HIDDEN) and encoded.dtype == jnp.float32
    assert bool(jnp.all(jnp.isfinite(encoded)))
    assert bool(jnp.all((words >= 0) & (words < VOCAB)))
    print("KERNEL_OK")
</pallas_src>

<mosaic_0001>
module attributes {stable_mosaic.version = 11 : i64} {
  func.func @_banet_kernel(%arg0: memref<6x8x32xf32, #tpu.memory_space<vmem>>, %arg1: memref<32x65xf32, #tpu.memory_space<vmem>>, %arg2: memref<1x65xf32, #tpu.memory_space<vmem>>, %arg3: memref<16x65xf32, #tpu.memory_space<vmem>>, %arg4: memref<32x64xf32, #tpu.memory_space<vmem>>, %arg5: memref<16x48xf32, #tpu.memory_space<vmem>>, %arg6: memref<1x48xf32, #tpu.memory_space<vmem>>, %arg7: memref<20x48xf32, #tpu.memory_space<vmem>>, %arg8: memref<1x48xf32, #tpu.memory_space<vmem>>, %arg9: memref<16x68xf32, #tpu.memory_space<vmem>>, %arg10: memref<1x68xf32, #tpu.memory_space<vmem>>, %arg11: memref<8x5xi32, #tpu.memory_space<vmem>>, %arg12: memref<8x16xf32, #tpu.memory_space<vmem>>) attributes {dimension_semantics = [], scalar_prefetch = 0 : i64, scratch_operands = 0 : i64, tpu.core_type = #tpu.core_type<tc>} {
    %c0 = arith.constant 0 : index
    %c0_0 = arith.constant 0 : index
    %0 = vector.load %arg1[%c0, %c0_0] : memref<32x65xf32, #tpu.memory_space<vmem>>, vector<32x65xf32>
    %c0_1 = arith.constant 0 : index
    %c0_2 = arith.constant 0 : index
    %1 = vector.load %arg2[%c0_1, %c0_2] : memref<1x65xf32, #tpu.memory_space<vmem>>, vector<1x65xf32>
    %c0_3 = arith.constant 0 : index
    %c0_4 = arith.constant 0 : index
    %2 = vector.load %arg3[%c0_3, %c0_4] : memref<16x65xf32, #tpu.memory_space<vmem>>, vector<16x65xf32>
    %c0_5 = arith.constant 0 : index
    %c0_6 = arith.constant 0 : index
    %3 = vector.load %arg4[%c0_5, %c0_6] : memref<32x64xf32, #tpu.memory_space<vmem>>, vector<32x64xf32>
    %c0_7 = arith.constant 0 : index
    %c0_8 = arith.constant 0 : index
    %4 = vector.load %arg5[%c0_7, %c0_8] : memref<16x48xf32, #tpu.memory_space<vmem>>, vector<16x48xf32>
    %c0_9 = arith.constant 0 : index
    %c0_10 = arith.constant 0 : index
    %5 = vector.load %arg6[%c0_9, %c0_10] : memref<1x48xf32, #tpu.memory_space<vmem>>, vector<1x48xf32>
    %c0_11 = arith.constant 0 : index
    %c0_12 = arith.constant 0 : index
    %6 = vector.load %arg7[%c0_11, %c0_12] : memref<20x48xf32, #tpu.memory_space<vmem>>, vector<20x48xf32>
    %c0_13 = arith.constant 0 : index
    %c0_14 = arith.constant 0 : index
    %7 = vector.load %arg8[%c0_13, %c0_14] : memref<1x48xf32, #tpu.memory_space<vmem>>, vector<1x48xf32>
    %c0_15 = arith.constant 0 : index
    %c0_16 = arith.constant 0 : index
    %8 = vector.load %arg9[%c0_15, %c0_16] : memref<16x68xf32, #tpu.memory_space<vmem>>, vector<16x68xf32>
    %c0_17 = arith.constant 0 : index
    %c0_18 = arith.constant 0 : index
    %9 = vector.load %arg10[%c0_17, %c0_18] : memref<1x68xf32, #tpu.memory_space<vmem>>, vector<1x68xf32>
    %c0_19 = arith.constant 0 : index
    %c0_20 = arith.constant 0 : index
    %c0_21 = arith.constant 0 : index
    %10 = vector.load %arg0[%c0_19, %c0_20, %c0_21] : memref<6x8x32xf32, #tpu.memory_space<vmem>>, vector<6x8x32xf32>
    %11 = vector.shape_cast %10 : vector<6x8x32xf32> to vector<48x32xf32>
    %cst = arith.constant dense<0.000000e+00> : vector<48x65xf32>
    %12 = tpu.matmul %11, %0, %cst {dimension_numbers = #tpu.dot_dimension_numbers<[1], [0], [0], [1], [0, 0, 1, 1], [], []>} : vector<48x32xf32>, vector<32x65xf32>, vector<48x65xf32> -> vector<48x65xf32>
    %13 = vector.broadcast %1 : vector<1x65xf32> to vector<48x65xf32>
    %14 = arith.addf %12, %13 : vector<48x65xf32>
    %15 = vector.shape_cast %14 : vector<48x65xf32> to vector<6x8x65xf32>
    %cst_22 = arith.constant 0.000000e+00 : f32
    %16 = vector.broadcast %cst_22 : f32 to vector<8x16xf32>
    %cst_23 = arith.constant 0.000000e+00 : f32
    %17 = vector.broadcast %cst_23 : f32 to vector<8x16xf32>
    %cst_24 = arith.constant 0.000000e+00 : f32
    %18 = vector.broadcast %cst_24 : f32 to vector<8x16xf32>
    %cst_25 = arith.constant 0.000000e+00 : f32
    %19 = vector.broadcast %cst_25 : f32 to vector<8x16xf32>
    %20 = vector.extract_strided_slice %15 {offsets = [0, 0, 0], sizes = [1, 8, 65], strides = [1, 1, 1]} : vector<6x8x65xf32> to vector<1x8x65xf32>
    %21 = vector.shape_cast %20 : vector<1x8x65xf32> to vector<8x65xf32>
    %cst_26 = arith.constant dense<0.000000e+00> : vector<8x65xf32>
    %22 = tpu.matmul %16, %2, %cst_26 {dimension_numbers = #tpu.dot_dimension_numbers<[1], [0], [0], [1], [0, 0, 1, 1], [], []>} : vector<8x16xf32>, vector<16x65xf32>, vector<8x65xf32> -> vector<8x65xf32>
    %23 = arith.addf %21, %22 : vector<8x65xf32>
    %24 = arith.negf %23 : vector<8x65xf32>
    %25 = math.exp %24 : vector<8x65xf32>
    %cst_27 = arith.constant 1.000000e+00 : f32
    %26 = vector.broadcast %cst_27 : f32 to vector<8x65xf32>
    %27 = arith.addf %26, %25 : vector<8x65xf32>
    %28 = arith.divf %26, %27 : vector<8x65xf32>
    %29 = math.tanh %23 : vector<8x65xf32>
    %30 = vector.extract_strided_slice %28 {offsets = [0, 64], sizes = [8, 1], strides = [1, 1]} : vector<8x65xf32> to vector<8x1xf32>
    %cst_28 = arith.constant 5.000000e-01 : f32
    %31 = vector.broadcast %cst_28 : f32 to vector<8x1xf32>
    %32 = arith.cmpf ogt, %30, %31 : vector<8x1xf32>
    %33 = arith.extui %32 : vector<8x1xi1> to vector<8x1xi32>
    %34 = arith.sitofp %33 : vector<8x1xi32> to vector<8x1xf32>
    %35 = vector.extract_strided_slice %28 {offsets = [0, 16], sizes = [8, 16], strides = [1, 1]} : vector<8x65xf32> to vector<8x16xf32>
    %36 = arith.mulf %35, %17 : vector<8x16xf32>
    %37 = vector.extract_strided_slice %28 {offsets = [0, 0], sizes = [8, 16], strides = [1, 1]} : vector<8x65xf32> to vector<8x16xf32>
    %38 = vector.extract_strided_slice %29 {offsets = [0, 32], sizes = [8, 16], strides = [1, 1]} : vector<8x65xf32> to vector<8x16xf32>
    %39 = arith.mulf %37, %38 : vector<8x16xf32>
    %40 = arith.addf %36, %39 : vector<8x16xf32>
    %41 = vector.extract_strided_slice %28 {offsets = [0, 48], sizes = [8, 16], strides = [1, 1]} : vector<8x65xf32> to vector<8x16xf32>
    %42 = math.tanh %40 : vector<8x16xf32>
    %43 = arith.mulf %41, %42 : vector<8x16xf32>
    %44 = vector.broadcast %34 : vector<8x1xf32> to vector<8x16xf32>
    %45 = arith.mulf %43, %44 : vector<8x16xf32>
    %46 = tpu.concatenate %45, %18 in 1 : vector<8x16xf32>, vector<8x16xf32> -> vector<8x32xf32>
    %cst_29 = arith.constant dense<0.000000e+00> : vector<8x64xf32>
    %47 = tpu.matmul %46, %3, %cst_29 {dimension_numbers = #tpu.dot_dimension_numbers<[1], [0], [0], [1], [0, 0, 1, 1], [], []>} : vector<8x32xf32>, vector<32x64xf32>, vector<8x64xf32> -> vector<8x64xf32>
    %48 = arith.negf %47 : vector<8x64xf32>
    %49 = math.exp %48 : vector<8x64xf32>
    %cst_30 = arith.constant 1.000000e+00 : f32
    %50 = vector.broadcast %cst_30 : f32 to vector<8x64xf32>
    %51 = arith.addf %50, %49 : vector<8x64xf32>
    %52 = arith.divf %50, %51 : vector<8x64xf32>
    %53 = math.tanh %47 : vector<8x64xf32>
    %54 = vector.extract_strided_slice %52 {offsets = [0, 16], sizes = [8, 16], strides = [1, 1]} : vector<8x64xf32> to vector<8x16xf32>
    %55 = arith.mulf %54, %19 : vector<8x16xf32>
    %56 = vector.extract_strided_slice %52 {offsets = [0, 0], sizes = [8, 16], strides = [1, 1]} : vector<8x64xf32> to vector<8x16xf32>
    %57 = vector.extract_strided_slice %53 {offsets = [0, 32], sizes = [8, 16], strides = [1, 1]} : vector<8x64xf32> to vector<8x16xf32>
    %58 = arith.mulf %56, %57 : vector<8x16xf32>
    %59 = arith.addf %55, %58 : vector<8x16xf32>
    %60 = vector.extract_strided_slice %52 {offsets = [0, 48], sizes = [8, 16], strides = [1, 1]} : vector<8x64xf32> to vector<8x16xf32>
    %61 = math.tanh %59 : vector<8x16xf32>
    %62 = arith.mulf %60, %61 : vector<8x16xf32>
    %cst_31 = arith.constant 1.000000e+00 : f32
    %63 = vector.broadcast %cst_31 : f32 to vector<8x1xf32>
    %64 = arith.subf %63, %34 : vector<8x1xf32>
    %65 = vector.broadcast %64 : vector<8x1xf32> to vector<8x16xf32>
    %66 = arith.mulf %43, %65 : vector<8x16xf32>
    %cst_32 = arith.constant 1.000000e+00 : f32
    %67 = vector.broadcast %cst_32 : f32 to vector<8x1xf32>
    %68 = arith.subf %67, %34 : vector<8x1xf32>
    %69 = vector.broadcast %68 : vector<8x1xf32> to vector<8x16xf32>
    %70 = arith.mulf %40, %69 : vector<8x16xf32>
    %71 = vector.extract_strided_slice %15 {offsets = [1, 0, 0], sizes = [1, 8, 65], strides = [1, 1, 1]} : vector<6x8x65xf32> to vector<1x8x65xf32>
    %72 = vector.shape_cast %71 : vector<1x8x65xf32> to vector<8x65xf32>
    %cst_33 = arith.constant dense<0.000000e+00> : vector<8x65xf32>
    %73 = tpu.matmul %66, %2, %cst_33 {dimension_numbers = #tpu.dot_dimension_numbers<[1], [0], [0], [1], [0, 0, 1, 1], [], []>} : vector<8x16xf32>, vector<16x65xf32>, vector<8x65xf32> -> vector<8x65xf32>
    %74 = arith.addf %72, %73 : vector<8x65xf32>
    %75 = arith.negf %74 : vector<8x65xf32>
    %76 = math.exp %75 : vector<8x65xf32>
    %cst_34 = arith.constant 1.000000e+00 : f32
    %77 = vector.broadcast %cst_34 : f32 to vector<8x65xf32>
    %78 = arith.addf %77, %76 : vector<8x65xf32>
    %79 = arith.divf %77, %78 : vector<8x65xf32>
    %80 = math.tanh %74 : vector<8x65xf32>
    %81 = vector.extract_strided_slice %79 {offsets = [0, 64], sizes = [8, 1], strides = [1, 1]} : vector<8x65xf32> to vector<8x1xf32>
    %cst_35 = arith.constant 5.000000e-01 : f32
    %82 = vector.broadcast %cst_35 : f32 to vector<8x1xf32>
    %83 = arith.cmpf ogt, %81, %82 : vector<8x1xf32>
    %84 = arith.extui %83 : vector<8x1xi1> to vector<8x1xi32>
    %85 = arith.sitofp %84 : vector<8x1xi32> to vector<8x1xf32>
    %86 = vector.extract_strided_slice %79 {offsets = [0, 16], sizes = [8, 16], strides = [1, 1]} : vector<8x65xf32> to vector<8x16xf32>
    %87 = arith.mulf %86, %70 : vector<8x16xf32>
    %88 = vector.extract_strided_slice %79 {offsets = [0, 0], sizes = [8, 16], strides = [1, 1]} : vector<8x65xf32> to vector<8x16xf32>
    %89 = vector.extract_strided_slice %80 {offsets = [0, 32], sizes = [8, 16], strides = [1, 1]} : vector<8x65xf32> to vector<8x16xf32>
    %90 = arith.mulf %88, %89 : vector<8x16xf32>
    %91 = arith.addf %87, %90 : vector<8x16xf32>
    %92 = vector.extract_strided_slice %79 {offsets = [0, 48], sizes = [8, 16], strides = [1, 1]} : vector<8x65xf32> to vector<8x16xf32>
    %93 = math.tanh %91 : vector<8x16xf32>
    %94 = arith.mulf %92, %93 : vector<8x16xf32>
    %95 = vector.broadcast %85 : vector<8x1xf32> to vector<8x16xf32>
    %96 = arith.mulf %94, %95 : vector<8x16xf32>
    %97 = tpu.concatenate %96, %62 in 1 : vector<8x16xf32>, vector<8x16xf32> -> vector<8x32xf32>
    %cst_36 = arith.constant dense<0.000000e+00> : vector<8x64xf32>
    %98 = tpu.matmul %97, %3, %cst_36 {dimension_numbers = #tpu.dot_dimension_numbers<[1], [0], [0], [1], [0, 0, 1, 1], [], []>} : vector<8x32xf32>, vector<32x64xf32>, vector<8x64xf32> -> vector<8x64xf32>
    %99 = arith.negf %98 : vector<8x64xf32>
    %100 = math.exp %99 : vector<8x64xf32>
    %cst_37 = arith.constant 1.000000e+00 : f32
    %101 = vector.broadcast %cst_37 : f32 to vector<8x64xf32>
    %102 = arith.addf %101, %100 : vector<8x64xf32>
    %103 = arith.divf %101, %102 : vector<8x64xf32>
    %104 = math.tanh %98 : vector<8x64xf32>
    %105 = vector.extract_strided_slice %103 {offsets = [0, 16], sizes = [8, 16], strides = [1, 1]} : vector<8x64xf32> to vector<8x16xf32>
    %106 = arith.mulf %105, %59 : vector<8x16xf32>
    %107 = vector.extract_strided_slice %103 {offsets = [0, 0], sizes = [8, 16], strides = [1, 1]} : vector<8x64xf32> to vector<8x16xf32>
    %108 = vector.extract_strided_slice %104 {offsets = [0, 32], sizes = [8, 16], strides = [1, 1]} : vector<8x64xf32> to vector<8x16xf32>
    %109 = arith.mulf %107, %108 : vector<8x16xf32>
    %110 = arith.addf %106, %109 : vector<8x16xf32>
    %111 = vector.extract_strided_slice %103 {offsets = [0, 48], sizes = [8, 16], strides = [1, 1]} : vector<8x64xf32> to vector<8x16xf32>
    %112 = math.tanh %110 : vector<8x16xf32>
    %113 = arith.mulf %111, %112 : vector<8x16xf32>
    %cst_38 = arith.constant 1.000000e+00 : f32
    %114 = vector.broadcast %cst_38 : f32 to vector<8x1xf32>
    %115 = arith.subf %114, %85 : vector<8x1xf32>
    %116 = vector.broadcast %115 : vector<8x1xf32> to vector<8x16xf32>
    %117 = arith.mulf %94, %116 : vector<8x16xf32>
    %cst_39 = arith.constant 1.000000e+00 : f32
    %118 = vector.broadcast %cst_39 : f32 to vector<8x1xf32>
    %119 = arith.subf %118, %85 : vector<8x1xf32>
    %120 = vector.broadcast %119 : vector<8x1xf32> to vector<8x16xf32>
    %121 = arith.mulf %91, %120 : vector<8x16xf32>
    %122 = vector.extract_strided_slice %15 {offsets = [2, 0, 0], sizes = [1, 8, 65], strides = [1, 1, 1]} : vector<6x8x65xf32> to vector<1x8x65xf32>
    %123 = vector.shape_cast %122 : vector<1x8x65xf32> to vector<8x65xf32>
    %cst_40 = arith.constant dense<0.000000e+00> : vector<8x65xf32>
    %124 = tpu.matmul %117, %2, %cst_40 {dimension_numbers = #tpu.dot_dimension_numbers<[1], [0], [0], [1], [0, 0, 1, 1], [], []>} : vector<8x16xf32>, vector<16x65xf32>, vector<8x65xf32> -> vector<8x65xf32>
    %125 = arith.addf %123, %124 : vector<8x65xf32>
    %126 = arith.negf %125 : vector<8x65xf32>
    %127 = math.exp %126 : vector<8x65xf32>
    %cst_41 = arith.constant 1.000000e+00 : f32
    %128 = vector.broadcast %cst_41 : f32 to vector<8x65xf32>
    %129 = arith.addf %128, %127 : vector<8x65xf32>
    %130 = arith.divf %128, %129 : vector<8x65xf32>
    %131 = math.tanh %125 : vector<8x65xf32>
    %132 = vector.extract_strided_slice %130 {offsets = [0, 64], sizes = [8, 1], strides = [1, 1]} : vector<8x65xf32> to vector<8x1xf32>
    %cst_42 = arith.constant 5.000000e-01 : f32
    %133 = vector.broadcast %cst_42 : f32 to vector<8x1xf32>
    %134 = arith.cmpf ogt, %132, %133 : vector<8x1xf32>
    %135 = arith.extui %134 : vector<8x1xi1> to vector<8x1xi32>
    %136 = arith.sitofp %135 : vector<8x1xi32> to vector<8x1xf32>
    %137 = vector.extract_strided_slice %130 {offsets = [0, 16], sizes = [8, 16], strides = [1, 1]} : vector<8x65xf32> to vector<8x16xf32>
    %138 = arith.mulf %137, %121 : vector<8x16xf32>
    %139 = vector.extract_strided_slice %130 {offsets = [0, 0], sizes = [8, 16], strides = [1, 1]} : vector<8x65xf32> to vector<8x16xf32>
    %140 = vector.extract_strided_slice %131 {offsets = [0, 32], sizes = [8, 16], strides = [1, 1]} : vector<8x65xf32> to vector<8x16xf32>
    %141 = arith.mulf %139, %140 : vector<8x16xf32>
    %142 = arith.addf %138, %141 : vector<8x16xf32>
    %143 = vector.extract_strided_slice %130 {offsets = [0, 48], sizes = [8, 16], strides = [1, 1]} : vector<8x65xf32> to vector<8x16xf32>
    %144 = math.tanh %142 : vector<8x16xf32>
    %145 = arith.mulf %143, %144 : vector<8x16xf32>
    %146 = vector.broadcast %136 : vector<8x1xf32> to vector<8x16xf32>
    %147 = arith.mulf %145, %146 : vector<8x16xf32>
    %148 = tpu.concatenate %147, %113 in 1 : vector<8x16xf32>, vector<8x16xf32> -> vector<8x32xf32>
    %cst_43 = arith.constant dense<0.000000e+00> : vector<8x64xf32>
    %149 = tpu.matmul %148, %3, %cst_43 {dimension_numbers = #tpu.dot_dimension_numbers<[1], [0], [0], [1], [0, 0, 1, 1], [], []>} : vector<8x32xf32>, vector<32x64xf32>, vector<8x64xf32> -> vector<8x64xf32>
    %150 = arith.negf %149 : vector<8x64xf32>
    %151 = math.exp %150 : vector<8x64xf32>
    %cst_44 = arith.constant 1.000000e+00 : f32
    %152 = vector.broadcast %cst_44 : f32 to vector<8x64xf32>
    %153 = arith.addf %152, %151 : vector<8x64xf32>
    %154 = arith.divf %152, %153 : vector<8x64xf32>
    %155 = math.tanh %149 : vector<8x64xf32>
    %156 = vector.extract_strided_slice %154 {offsets = [0, 16], sizes = [8, 16], strides = [1, 1]} : vector<8x64xf32> to vector<8x16xf32>
    %157 = arith.mulf %156, %110 : vector<8x16xf32>
    %158 = vector.extract_strided_slice %154 {offsets = [0, 0], sizes = [8, 16], strides = [1, 1]} : vector<8x64xf32> to vector<8x16xf32>
    %159 = vector.extract_strided_slice %155 {offsets = [0, 32], sizes = [8, 16], strides = [1, 1]} : vector<8x64xf32> to vector<8x16xf32>
    %160 = arith.mulf %158, %159 : vector<8x16xf32>
    %161 = arith.addf %157, %160 : vector<8x16xf32>
    %162 = vector.extract_strided_slice %154 {offsets = [0, 48], sizes = [8, 16], strides = [1, 1]} : vector<8x64xf32> to vector<8x16xf32>
    %163 = math.tanh %161 : vector<8x16xf32>
    %164 = arith.mulf %162, %163 : vector<8x16xf32>
    %cst_45 = arith.constant 1.000000e+00 : f32
    %165 = vector.broadcast %cst_45 : f32 to vector<8x1xf32>
    %166 = arith.subf %165, %136 : vector<8x1xf32>
    %167 = vector.broadcast %166 : vector<8x1xf32> to vector<8x16xf32>
    %168 = arith.mulf %145, %167 : vector<8x16xf32>
    %cst_46 = arith.constant 1.000000e+00 : f32
    %169 = vector.broadcast %cst_46 : f32 to vector<8x1xf32>
    %170 = arith.subf %169, %136 : vector<8x1xf32>
    %171 = vector.broadcast %170 : vector<8x1xf32> to vector<8x16xf32>
    %172 = arith.mulf %142, %171 : vector<8x16xf32>
    %173 = vector.extract_strided_slice %15 {offsets = [3, 0, 0], sizes = [1, 8, 65], strides = [1, 1, 1]} : vector<6x8x65xf32> to vector<1x8x65xf32>
    %174 = vector.shape_cast %173 : vector<1x8x65xf32> to vector<8x65xf32>
    %cst_47 = arith.constant dense<0.000000e+00> : vector<8x65xf32>
    %175 = tpu.matmul %168, %2, %cst_47 {dimension_numbers = #tpu.dot_dimension_numbers<[1], [0], [0], [1], [0, 0, 1, 1], [], []>} : vector<8x16xf32>, vector<16x65xf32>, vector<8x65xf32> -> vector<8x65xf32>
    %176 = arith.addf %174, %175 : vector<8x65xf32>
    %177 = arith.negf %176 : vector<8x65xf32>
    %178 = math.exp %177 : vector<8x65xf32>
    %cst_48 = arith.constant 1.000000e+00 : f32
    %179 = vector.broadcast %cst_48 : f32 to vector<8x65xf32>
    %180 = arith.addf %179, %178 : vector<8x65xf32>
    %181 = arith.divf %179, %180 : vector<8x65xf32>
    %182 = math.tanh %176 : vector<8x65xf32>
    %183 = vector.extract_strided_slice %181 {offsets = [0, 64], sizes = [8, 1], strides = [1, 1]} : vector<8x65xf32> to vector<8x1xf32>
    %cst_49 = arith.constant 5.000000e-01 : f32
    %184 = vector.broadcast %cst_49 : f32 to vector<8x1xf32>
    %185 = arith.cmpf ogt, %183, %184 : vector<8x1xf32>
    %186 = arith.extui %185 : vector<8x1xi1> to vector<8x1xi32>
    %187 = arith.sitofp %186 : vector<8x1xi32> to vector<8x1xf32>
    %188 = vector.extract_strided_slice %181 {offsets = [0, 16], sizes = [8, 16], strides = [1, 1]} : vector<8x65xf32> to vector<8x16xf32>
    %189 = arith.mulf %188, %172 : vector<8x16xf32>
    %190 = vector.extract_strided_slice %181 {offsets = [0, 0], sizes = [8, 16], strides = [1, 1]} : vector<8x65xf32> to vector<8x16xf32>
    %191 = vector.extract_strided_slice %182 {offsets = [0, 32], sizes = [8, 16], strides = [1, 1]} : vector<8x65xf32> to vector<8x16xf32>
    %192 = arith.mulf %190, %191 : vector<8x16xf32>
    %193 = arith.addf %189, %192 : vector<8x16xf32>
    %194 = vector.extract_strided_slice %181 {offsets = [0, 48], sizes = [8, 16], strides = [1, 1]} : vector<8x65xf32> to vector<8x16xf32>
    %195 = math.tanh %193 : vector<8x16xf32>
    %196 = arith.mulf %194, %195 : vector<8x16xf32>
    %197 = vector.broadcast %187 : vector<8x1xf32> to vector<8x16xf32>
    %198 = arith.mulf %196, %197 : vector<8x16xf32>
    %199 = tpu.concatenate %198, %164 in 1 : vector<8x16xf32>, vector<8x16xf32> -> vector<8x32xf32>
    %cst_50 = arith.constant dense<0.000000e+00> : vector<8x64xf32>
    %200 = tpu.matmul %199, %3, %cst_50 {dimension_numbers = #tpu.dot_dimension_numbers<[1], [0], [0], [1], [0, 0, 1, 1], [], []>} : vector<8x32xf32>, vector<32x64xf32>, vector<8x64xf32> -> vector<8x64xf32>
    %201 = arith.negf %200 : vector<8x64xf32>
    %202 = math.exp %201 : vector<8x64xf32>
    %cst_51 = arith.constant 1.000000e+00 : f32
    %203 = vector.broadcast %cst_51 : f32 to vector<8x64xf32>
    %204 = arith.addf %203, %202 : vector<8x64xf32>
    %205 = arith.divf %203, %204 : vector<8x64xf32>
    %206 = math.tanh %200 : vector<8x64xf32>
    %207 = vector.extract_strided_slice %205 {offsets = [0, 16], sizes = [8, 16], strides = [1, 1]} : vector<8x64xf32> to vector<8x16xf32>
    %208 = arith.mulf %207, %161 : vector<8x16xf32>
    %209 = vector.extract_strided_slice %205 {offsets = [0, 0], sizes = [8, 16], strides = [1, 1]} : vector<8x64xf32> to vector<8x16xf32>
    %210 = vector.extract_strided_slice %206 {offsets = [0, 32], sizes = [8, 16], strides = [1, 1]} : vector<8x64xf32> to vector<8x16xf32>
    %211 = arith.mulf %209, %210 : vector<8x16xf32>
    %212 = arith.addf %208, %211 : vector<8x16xf32>
    %213 = vector.extract_strided_slice %205 {offsets = [0, 48], sizes = [8, 16], strides = [1, 1]} : vector<8x64xf32> to vector<8x16xf32>
    %214 = math.tanh %212 : vector<8x16xf32>
    %215 = arith.mulf %213, %214 : vector<8x16xf32>
    %cst_52 = arith.constant 1.000000e+00 : f32
    %216 = vector.broadcast %cst_52 : f32 to vector<8x1xf32>
    %217 = arith.subf %216, %187 : vector<8x1xf32>
    %218 = vector.broadcast %217 : vector<8x1xf32> to vector<8x16xf32>
    %219 = arith.mulf %196, %218 : vector<8x16xf32>
    %cst_53 = arith.constant 1.000000e+00 : f32
    %220 = vector.broadcast %cst_53 : f32 to vector<8x1xf32>
    %221 = arith.subf %220, %187 : vector<8x1xf32>
    %222 = vector.broadcast %221 : vector<8x1xf32> to vector<8x16xf32>
    %223 = arith.mulf %193, %222 : vector<8x16xf32>
    %224 = vector.extract_strided_slice %15 {offsets = [4, 0, 0], sizes = [1, 8, 65], strides = [1, 1, 1]} : vector<6x8x65xf32> to vector<1x8x65xf32>
    %225 = vector.shape_cast %224 : vector<1x8x65xf32> to vector<8x65xf32>
    %cst_54 = arith.constant dense<0.000000e+00> : vector<8x65xf32>
    %226 = tpu.matmul %219, %2, %cst_54 {dimension_numbers = #tpu.dot_dimension_numbers<[1], [0], [0], [1], [0, 0, 1, 1], [], []>} : vector<8x16xf32>, vector<16x65xf32>, vector<8x65xf32> -> vector<8x65xf32>
    %227 = arith.addf %225, %226 : vector<8x65xf32>
    %228 = arith.negf %227 : vector<8x65xf32>
    %229 = math.exp %228 : vector<8x65xf32>
    %cst_55 = arith.constant 1.000000e+00 : f32
    %230 = vector.broadcast %cst_55 : f32 to vector<8x65xf32>
    %231 = arith.addf %230, %229 : vector<8x65xf32>
    %232 = arith.divf %230, %231 : vector<8x65xf32>
    %233 = math.tanh %227 : vector<8x65xf32>
    %234 = vector.extract_strided_slice %232 {offsets = [0, 64], sizes = [8, 1], strides = [1, 1]} : vector<8x65xf32> to vector<8x1xf32>
    %cst_56 = arith.constant 5.000000e-01 : f32
    %235 = vector.broadcast %cst_56 : f32 to vector<8x1xf32>
    %236 = arith.cmpf ogt, %234, %235 : vector<8x1xf32>
    %237 = arith.extui %236 : vector<8x1xi1> to vector<8x1xi32>
    %238 = arith.sitofp %237 : vector<8x1xi32> to vector<8x1xf32>
    %239 = vector.extract_strided_slice %232 {offsets = [0, 16], sizes = [8, 16], strides = [1, 1]} : vector<8x65xf32> to vector<8x16xf32>
    %240 = arith.mulf %239, %223 : vector<8x16xf32>
    %241 = vector.extract_strided_slice %232 {offsets = [0, 0], sizes = [8, 16], strides = [1, 1]} : vector<8x65xf32> to vector<8x16xf32>
    %242 = vector.extract_strided_slice %233 {offsets = [0, 32], sizes = [8, 16], strides = [1, 1]} : vector<8x65xf32> to vector<8x16xf32>
    %243 = arith.mulf %241, %242 : vector<8x16xf32>
    %244 = arith.addf %240, %243 : vector<8x16xf32>
    %245 = vector.extract_strided_slice %232 {offsets = [0, 48], sizes = [8, 16], strides = [1, 1]} : vector<8x65xf32> to vector<8x16xf32>
    %246 = math.tanh %244 : vector<8x16xf32>
    %247 = arith.mulf %245, %246 : vector<8x16xf32>
    %248 = vector.broadcast %238 : vector<8x1xf32> to vector<8x16xf32>
    %249 = arith.mulf %247, %248 : vector<8x16xf32>
    %250 = tpu.concatenate %249, %215 in 1 : vector<8x16xf32>, vector<8x16xf32> -> vector<8x32xf32>
    %cst_57 = arith.constant dense<0.000000e+00> : vector<8x64xf32>
    %251 = tpu.matmul %250, %3, %cst_57 {dimension_numbers = #tpu.dot_dimension_numbers<[1], [0], [0], [1], [0, 0, 1, 1], [], []>} : vector<8x32xf32>, vector<32x64xf32>, vector<8x64xf32> -> vector<8x64xf32>
    %252 = arith.negf %251 : vector<8x64xf32>
    %253 = math.exp %252 : vector<8x64xf32>
    %cst_58 = arith.constant 1.000000e+00 : f32
    %254 = vector.broadcast %cst_58 : f32 to vector<8x64xf32>
    %255 = arith.addf %254, %253 : vector<8x64xf32>
    %256 = arith.divf %254, %255 : vector<8x64xf32>
    %257 = math.tanh %251 : vector<8x64xf32>
    %258 = vector.extract_strided_slice %256 {offsets = [0, 16], sizes = [8, 16], strides = [1, 1]} : vector<8x64xf32> to vector<8x16xf32>
    %259 = arith.mulf %258, %212 : vector<8x16xf32>
    %260 = vector.extract_strided_slice %256 {offsets = [0, 0], sizes = [8, 16], strides = [1, 1]} : vector<8x64xf32> to vector<8x16xf32>
    %261 = vector.extract_strided_slice %257 {offsets = [0, 32], sizes = [8, 16], strides = [1, 1]} : vector<8x64xf32> to vector<8x16xf32>
    %262 = arith.mulf %260, %261 : vector<8x16xf32>
    %263 = arith.addf %259, %262 : vector<8x16xf32>
    %264 = vector.extract_strided_slice %256 {offsets = [0, 48], sizes = [8, 16], strides = [1, 1]} : vector<8x64xf32> to vector<8x16xf32>
    %265 = math.tanh %263 : vector<8x16xf32>
    %266 = arith.mulf %264, %265 : vector<8x16xf32>
    %cst_59 = arith.constant 1.000000e+00 : f32
    %267 = vector.broadcast %cst_59 : f32 to vector<8x1xf32>
    %268 = arith.subf %267, %238 : vector<8x1xf32>
    %269 = vector.broadcast %268 : vector<8x1xf32> to vector<8x16xf32>
    %270 = arith.mulf %247, %269 : vector<8x16xf32>
    %cst_60 = arith.constant 1.000000e+00 : f32
    %271 = vector.broadcast %cst_60 : f32 to vector<8x1xf32>
    %272 = arith.subf %271, %238 : vector<8x1xf32>
    %273 = vector.broadcast %272 : vector<8x1xf32> to vector<8x16xf32>
    %274 = arith.mulf %244, %273 : vector<8x16xf32>
    %275 = vector.extract_strided_slice %15 {offsets = [5, 0, 0], sizes = [1, 8, 65], strides = [1, 1, 1]} : vector<6x8x65xf32> to vector<1x8x65xf32>
    %276 = vector.shape_cast %275 : vector<1x8x65xf32> to vector<8x65xf32>
    %cst_61 = arith.constant dense<0.000000e+00> : vector<8x65xf32>
    %277 = tpu.matmul %270, %2, %cst_61 {dimension_numbers = #tpu.dot_dimension_numbers<[1], [0], [0], [1], [0, 0, 1, 1], [], []>} : vector<8x16xf32>, vector<16x65xf32>, vector<8x65xf32> -> vector<8x65xf32>
    %278 = arith.addf %276, %277 : vector<8x65xf32>
    %279 = arith.negf %278 : vector<8x65xf32>
    %280 = math.exp %279 : vector<8x65xf32>
    %cst_62 = arith.constant 1.000000e+00 : f32
    %281 = vector.broadcast %cst_62 : f32 to vector<8x65xf32>
    %282 = arith.addf %281, %280 : vector<8x65xf32>
    %283 = arith.divf %281, %282 : vector<8x65xf32>
    %284 = math.tanh %278 : vector<8x65xf32>
    %285 = vector.extract_strided_slice %283 {offsets = [0, 64], sizes = [8, 1], strides = [1, 1]} : vector<8x65xf32> to vector<8x1xf32>
    %cst_63 = arith.constant 5.000000e-01 : f32
    %286 = vector.broadcast %cst_63 : f32 to vector<8x1xf32>
    %287 = arith.cmpf ogt, %285, %286 : vector<8x1xf32>
    %288 = arith.extui %287 : vector<8x1xi1> to vector<8x1xi32>
    %289 = arith.sitofp %288 : vector<8x1xi32> to vector<8x1xf32>
    %290 = vector.extract_strided_slice %283 {offsets = [0, 16], sizes = [8, 16], strides = [1, 1]} : vector<8x65xf32> to vector<8x16xf32>
    %291 = arith.mulf %290, %274 : vector<8x16xf32>
    %292 = vector.extract_strided_slice %283 {offsets = [0, 0], sizes = [8, 16], strides = [1, 1]} : vector<8x65xf32> to vector<8x16xf32>
    %293 = vector.extract_strided_slice %284 {offsets = [0, 32], sizes = [8, 16], strides = [1, 1]} : vector<8x65xf32> to vector<8x16xf32>
    %294 = arith.mulf %292, %293 : vector<8x16xf32>
    %295 = arith.addf %291, %294 : vector<8x16xf32>
    %296 = vector.extract_strided_slice %283 {offsets = [0, 48], sizes = [8, 16], strides = [1, 1]} : vector<8x65xf32> to vector<8x16xf32>
    %297 = math.tanh %295 : vector<8x16xf32>
    %298 = arith.mulf %296, %297 : vector<8x16xf32>
    %299 = vector.broadcast %289 : vector<8x1xf32> to vector<8x16xf32>
    %300 = arith.mulf %298, %299 : vector<8x16xf32>
    %301 = tpu.concatenate %300, %266 in 1 : vector<8x16xf32>, vector<8x16xf32> -> vector<8x32xf32>
    %cst_64 = arith.constant dense<0.000000e+00> : vector<8x64xf32>
    %302 = tpu.matmul %301, %3, %cst_64 {dimension_numbers = #tpu.dot_dimension_numbers<[1], [0], [0], [1], [0, 0, 1, 1], [], []>} : vector<8x32xf32>, vector<32x64xf32>, vector<8x64xf32> -> vector<8x64xf32>
    %303 = arith.negf %302 : vector<8x64xf32>
    %304 = math.exp %303 : vector<8x64xf32>
    %cst_65 = arith.constant 1.000000e+00 : f32
    %305 = vector.broadcast %cst_65 : f32 to vector<8x64xf32>
    %306 = arith.addf %305, %304 : vector<8x64xf32>
    %307 = arith.divf %305, %306 : vector<8x64xf32>
    %308 = math.tanh %302 : vector<8x64xf32>
    %309 = vector.extract_strided_slice %307 {offsets = [0, 16], sizes = [8, 16], strides = [1, 1]} : vector<8x64xf32> to vector<8x16xf32>
    %310 = arith.mulf %309, %263 : vector<8x16xf32>
    %311 = vector.extract_strided_slice %307 {offsets = [0, 0], sizes = [8, 16], strides = [1, 1]} : vector<8x64xf32> to vector<8x16xf32>
    %312 = vector.extract_strided_slice %308 {offsets = [0, 32], sizes = [8, 16], strides = [1, 1]} : vector<8x64xf32> to vector<8x16xf32>
    %313 = arith.mulf %311, %312 : vector<8x16xf32>
    %314 = arith.addf %310, %313 : vector<8x16xf32>
    %315 = vector.extract_strided_slice %307 {offsets = [0, 48], sizes = [8, 16], strides = [1, 1]} : vector<8x64xf32> to vector<8x16xf32>
    %316 = math.tanh %314 : vector<8x16xf32>
    %317 = arith.mulf %315, %316 : vector<8x16xf32>
    %c0_66 = arith.constant 0 : index
    %c0_67 = arith.constant 0 : index
    %318 = vector.load %arg12[%c0_66, %c0_67] : memref<8x16xf32, #tpu.memory_space<vmem>>, vector<8x16xf32>
    tpu.vector_store %arg12[%c0_66, %c0_67], %317 {strides = array<i32>} : memref<8x16xf32, #tpu.memory_space<vmem>>, vector<8x16xf32>,
    %cst_68 = arith.constant dense<0.000000e+00> : vector<8x48xf32>
    %319 = tpu.matmul %317, %4, %cst_68 {dimension_numbers = #tpu.dot_dimension_numbers<[1], [0], [0], [1], [0, 0, 1, 1], [], []>} : vector<8x16xf32>, vector<16x48xf32>, vector<8x48xf32> -> vector<8x48xf32>
    %320 = vector.broadcast %5 : vector<1x48xf32> to vector<8x48xf32>
    %321 = arith.addf %319, %320 : vector<8x48xf32>
    %322 = vector.shape_cast %7 : vector<1x48xf32> to vector<1x48xf32>
    %323 = vector.broadcast %322 : vector<1x48xf32> to vector<8x48xf32>
    %324 = vector.extract_strided_slice %9 {offsets = [0, 0], sizes = [1, 48], strides = [1, 1]} : vector<1x68xf32> to vector<1x48xf32>
    %325 = vector.shape_cast %324 : vector<1x48xf32> to vector<1x48xf32>
    %326 = vector.broadcast %325 : vector<1x48xf32> to vector<8x48xf32>
    %cst_69 = arith.constant 0.000000e+00 : f32
    %327 = vector.broadcast %cst_69 : f32 to vector<8x16xf32>
    %328 = tpu.iota {dimensions = array<i32: 1>} : vector<8x20xi32>
    %329 = tpu.iota {dimensions = array<i32: 1>} : vector<8x68xi32>
    %330 = tpu.iota {dimensions = array<i32: 1>} : vector<8x5xi32>
    %c0_i32 = arith.constant 0 : i32
    %331 = vector.broadcast %c0_i32 : i32 to vector<8x5xi32>
    %332 = arith.addf %321, %323 : vector<8x48xf32>
    %333 = arith.addf %332, %326 : vector<8x48xf32>
    %334 = arith.negf %333 : vector<8x48xf32>
    %335 = math.exp %334 : vector<8x48xf32>
    %cst_70 = arith.constant 1.000000e+00 : f32
    %336 = vector.broadcast %cst_70 : f32 to vector<8x48xf32>
    %337 = arith.addf %336, %335 : vector<8x48xf32>
    %338 = arith.divf %336, %337 : vector<8x48xf32>
    %339 = vector.extract_strided_slice %338 {offsets = [0, 0], sizes = [8, 16], strides = [1, 1]} : vector<8x48xf32> to vector<8x16xf32>
    %340 = vector.extract_strided_slice %338 {offsets = [0, 16], sizes = [8, 16], strides = [1, 1]} : vector<8x48xf32> to vector<8x16xf32>
    %341 = vector.extract_strided_slice %332 {offsets = [0, 32], sizes = [8, 16], strides = [1, 1]} : vector<8x48xf32> to vector<8x16xf32>
    %342 = vector.extract_strided_slice %326 {offsets = [0, 32], sizes = [8, 16], strides = [1, 1]} : vector<8x48xf32> to vector<8x16xf32>
    %343 = arith.mulf %339, %342 : vector<8x16xf32>
    %344 = arith.addf %341, %343 : vector<8x16xf32>
    %345 = math.tanh %344 : vector<8x16xf32>
    %cst_71 = arith.constant 1.000000e+00 : f32
    %346 = vector.broadcast %cst_71 : f32 to vector<8x16xf32>
    %347 = arith.subf %346, %340 : vector<8x16xf32>
    %348 = arith.mulf %347, %345 : vector<8x16xf32>
    %349 = arith.mulf %340, %327 : vector<8x16xf32>
    %350 = arith.addf %348, %349 : vector<8x16xf32>
    %cst_72 = arith.constant dense<0.000000e+00> : vector<8x68xf32>
    %351 = tpu.matmul %350, %8, %cst_72 {dimension_numbers = #tpu.dot_dimension_numbers<[1], [0], [0], [1], [0, 0, 1, 1], [], []>} : vector<8x16xf32>, vector<16x68xf32>, vector<8x68xf32> -> vector<8x68xf32>
    %352 = vector.broadcast %9 : vector<1x68xf32> to vector<8x68xf32>
    %353 = arith.addf %351, %352 : vector<8x68xf32>
    %354 = vector.extract_strided_slice %353 {offsets = [0, 0], sizes = [8, 48], strides = [1, 1]} : vector<8x68xf32> to vector<8x48xf32>
    %c48_i32 = arith.constant 48 : i32
    %355 = vector.broadcast %c48_i32 : i32 to vector<8x68xi32>
    %356 = arith.cmpi sge, %329, %355 : vector<8x68xi32>
    %cst_73 = arith.constant 0xFF800000 : f32
    %357 = vector.broadcast %cst_73 : f32 to vector<8x68xf32>
    %358 = arith.select %356, %353, %357 : vector<8x68xi1>, vector<8x68xf32>
    %cst_74 = arith.constant dense<0xFF800000> : vector<8xf32>
    %359 = vector.multi_reduction <maximumf>, %358, %cst_74 [1] : vector<8x68xf32> to vector<8xf32>
    %360 = vector.shape_cast %359 : vector<8xf32> to vector<8x1xf32>
    %361 = vector.broadcast %360 : vector<8x1xf32> to vector<8x68xf32>
    %362 = arith.cmpf oge, %358, %361 : vector<8x68xf32>
    %c48_i32_75 = arith.constant 48 : i32
    %363 = vector.broadcast %c48_i32_75 : i32 to vector<8x68xi32>
    %364 = arith.subi %329, %363 : vector<8x68xi32>
    %c20_i32 = arith.constant 20 : i32
    %365 = vector.broadcast %c20_i32 : i32 to vector<8x68xi32>
    %366 = arith.select %362, %364, %365 : vector<8x68xi1>, vector<8x68xi32>
    %cst_76 = arith.constant dense<2147483647> : vector<8xi32>
    %367 = vector.multi_reduction <minsi>, %366, %cst_76 [1] : vector<8x68xi32> to vector<8xi32>
    %368 = vector.shape_cast %367 : vector<8xi32> to vector<8x1xi32>
    %c0_i32_77 = arith.constant 0 : i32
    %369 = vector.broadcast %c0_i32_77 : i32 to vector<8x5xi32>
    %370 = arith.cmpi eq, %330, %369 : vector<8x5xi32>
    %371 = vector.shape_cast %368 : vector<8x1xi32> to vector<8x1xi32>
    %372 = vector.broadcast %371 : vector<8x1xi32> to vector<8x5xi32>
    %373 = arith.select %370, %372, %331 : vector<8x5xi1>, vector<8x5xi32>
    %374 = vector.broadcast %368 : vector<8x1xi32> to vector<8x20xi32>
    %375 = arith.cmpi eq, %328, %374 : vector<8x20xi32>
    %376 = arith.extui %375 : vector<8x20xi1> to vector<8x20xi32>
    %377 = arith.sitofp %376 : vector<8x20xi32> to vector<8x20xf32>
    %cst_78 = arith.constant dense<0.000000e+00> : vector<8x48xf32>
    %378 = tpu.matmul %377, %6, %cst_78 {dimension_numbers = #tpu.dot_dimension_numbers<[1], [0], [0], [1], [0, 0, 1, 1], [], []>} : vector<8x20xf32>, vector<20x48xf32>, vector<8x48xf32> -> vector<8x48xf32>
    %379 = arith.addf %321, %378 : vector<8x48xf32>
    %380 = arith.addf %379, %354 : vector<8x48xf32>
    %381 = arith.negf %380 : vector<8x48xf32>
    %382 = math.exp %381 : vector<8x48xf32>
    %cst_79 = arith.constant 1.000000e+00 : f32
    %383 = vector.broadcast %cst_79 : f32 to vector<8x48xf32>
    %384 = arith.addf %383, %382 : vector<8x48xf32>
    %385 = arith.divf %383, %384 : vector<8x48xf32>
    %386 = vector.extract_strided_slice %385 {offsets = [0, 0], sizes = [8, 16], strides = [1, 1]} : vector<8x48xf32> to vector<8x16xf32>
    %387 = vector.extract_strided_slice %385 {offsets = [0, 16], sizes = [8, 16], strides = [1, 1]} : vector<8x48xf32> to vector<8x16xf32>
    %388 = vector.extract_strided_slice %379 {offsets = [0, 32], sizes = [8, 16], strides = [1, 1]} : vector<8x48xf32> to vector<8x16xf32>
    %389 = vector.extract_strided_slice %354 {offsets = [0, 32], sizes = [8, 16], strides = [1, 1]} : vector<8x48xf32> to vector<8x16xf32>
    %390 = arith.mulf %386, %389 : vector<8x16xf32>
    %391 = arith.addf %388, %390 : vector<8x16xf32>
    %392 = math.tanh %391 : vector<8x16xf32>
    %cst_80 = arith.constant 1.000000e+00 : f32
    %393 = vector.broadcast %cst_80 : f32 to vector<8x16xf32>
    %394 = arith.subf %393, %387 : vector<8x16xf32>
    %395 = arith.mulf %394, %392 : vector<8x16xf32>
    %396 = arith.mulf %387, %350 : vector<8x16xf32>
    %397 = arith.addf %395, %396 : vector<8x16xf32>
    %cst_81 = arith.constant dense<0.000000e+00> : vector<8x68xf32>
    %398 = tpu.matmul %397, %8, %cst_81 {dimension_numbers = #tpu.dot_dimension_numbers<[1], [0], [0], [1], [0, 0, 1, 1], [], []>} : vector<8x16xf32>, vector<16x68xf32>, vector<8x68xf32> -> vector<8x68xf32>
    %399 = vector.broadcast %9 : vector<1x68xf32> to vector<8x68xf32>
    %400 = arith.addf %398, %399 : vector<8x68xf32>
    %401 = vector.extract_strided_slice %400 {offsets = [0, 0], sizes = [8, 48], strides = [1, 1]} : vector<8x68xf32> to vector<8x48xf32>
    %c48_i32_82 = arith.constant 48 : i32
    %402 = vector.broadcast %c48_i32_82 : i32 to vector<8x68xi32>
    %403 = arith.cmpi sge, %329, %402 : vector<8x68xi32>
    %cst_83 = arith.constant 0xFF800000 : f32
    %404 = vector.broadcast %cst_83 : f32 to vector<8x68xf32>
    %405 = arith.select %403, %400, %404 : vector<8x68xi1>, vector<8x68xf32>
    %cst_84 = arith.constant dense<0xFF800000> : vector<8xf32>
    %406 = vector.multi_reduction <maximumf>, %405, %cst_84 [1] : vector<8x68xf32> to vector<8xf32>
    %407 = vector.shape_cast %406 : vector<8xf32> to vector<8x1xf32>
    %408 = vector.broadcast %407 : vector<8x1xf32> to vector<8x68xf32>
    %409 = arith.cmpf oge, %405, %408 : vector<8x68xf32>
    %c48_i32_85 = arith.constant 48 : i32
    %410 = vector.broadcast %c48_i32_85 : i32 to vector<8x68xi32>
    %411 = arith.subi %329, %410 : vector<8x68xi32>
    %c20_i32_86 = arith.constant 20 : i32
    %412 = vector.broadcast %c20_i32_86 : i32 to vector<8x68xi32>
    %413 = arith.select %409, %411, %412 : vector<8x68xi1>, vector<8x68xi32>
    %cst_87 = arith.constant dense<2147483647> : vector<8xi32>
    %414 = vector.multi_reduction <minsi>, %413, %cst_87 [1] : vector<8x68xi32> to vector<8xi32>
    %415 = vector.shape_cast %414 : vector<8xi32> to vector<8x1xi32>
    %c1_i32 = arith.constant 1 : i32
    %416 = vector.broadcast %c1_i32 : i32 to vector<8x5xi32>
    %417 = arith.cmpi eq, %330, %416 : vector<8x5xi32>
    %418 = vector.shape_cast %415 : vector<8x1xi32> to vector<8x1xi32>
    %419 = vector.broadcast %418 : vector<8x1xi32> to vector<8x5xi32>
    %420 = arith.select %417, %419, %373 : vector<8x5xi1>, vector<8x5xi32>
    %421 = vector.broadcast %415 : vector<8x1xi32> to vector<8x20xi32>
    %422 = arith.cmpi eq, %328, %421 : vector<8x20xi32>
    %423 = arith.extui %422 : vector<8x20xi1> to vector<8x20xi32>
    %424 = arith.sitofp %423 : vector<8x20xi32> to vector<8x20xf32>
    %cst_88 = arith.constant dense<0.000000e+00> : vector<8x48xf32>
    %425 = tpu.matmul %424, %6, %cst_88 {dimension_numbers = #tpu.dot_dimension_numbers<[1], [0], [0], [1], [0, 0, 1, 1], [], []>} : vector<8x20xf32>, vector<20x48xf32>, vector<8x48xf32> -> vector<8x48xf32>
    %426 = arith.addf %321, %425 : vector<8x48xf32>
    %427 = arith.addf %426, %401 : vector<8x48xf32>
    %428 = arith.negf %427 : vector<8x48xf32>
    %429 = math.exp %428 : vector<8x48xf32>
    %cst_89 = arith.constant 1.000000e+00 : f32
    %430 = vector.broadcast %cst_89 : f32 to vector<8x48xf32>
    %431 = arith.addf %430, %429 : vector<8x48xf32>
    %432 = arith.divf %430, %431 : vector<8x48xf32>
    %433 = vector.extract_strided_slice %432 {offsets = [0, 0], sizes = [8, 16], strides = [1, 1]} : vector<8x48xf32> to vector<8x16xf32>
    %434 = vector.extract_strided_slice %432 {offsets = [0, 16], sizes = [8, 16], strides = [1, 1]} : vector<8x48xf32> to vector<8x16xf32>
    %435 = vector.extract_strided_slice %426 {offsets = [0, 32], sizes = [8, 16], strides = [1, 1]} : vector<8x48xf32> to vector<8x16xf32>
    %436 = vector.extract_strided_slice %401 {offsets = [0, 32], sizes = [8, 16], strides = [1, 1]} : vector<8x48xf32> to vector<8x16xf32>
    %437 = arith.mulf %433, %436 : vector<8x16xf32>
    %438 = arith.addf %435, %437 : vector<8x16xf32>
    %439 = math.tanh %438 : vector<8x16xf32>
    %cst_90 = arith.constant 1.000000e+00 : f32
    %440 = vector.broadcast %cst_90 : f32 to vector<8x16xf32>
    %441 = arith.subf %440, %434 : vector<8x16xf32>
    %442 = arith.mulf %441, %439 : vector<8x16xf32>
    %443 = arith.mulf %434, %397 : vector<8x16xf32>
    %444 = arith.addf %442, %443 : vector<8x16xf32>
    %cst_91 = arith.constant dense<0.000000e+00> : vector<8x68xf32>
    %445 = tpu.matmul %444, %8, %cst_91 {dimension_numbers = #tpu.dot_dimension_numbers<[1], [0], [0], [1], [0, 0, 1, 1], [], []>} : vector<8x16xf32>, vector<16x68xf32>, vector<8x68xf32> -> vector<8x68xf32>
    %446 = vector.broadcast %9 : vector<1x68xf32> to vector<8x68xf32>
    %447 = arith.addf %445, %446 : vector<8x68xf32>
    %448 = vector.extract_strided_slice %447 {offsets = [0, 0], sizes = [8, 48], strides = [1, 1]} : vector<8x68xf32> to vector<8x48xf32>
    %c48_i32_92 = arith.constant 48 : i32
    %449 = vector.broadcast %c48_i32_92 : i32 to vector<8x68xi32>
    %450 = arith.cmpi sge, %329, %449 : vector<8x68xi32>
    %cst_93 = arith.constant 0xFF800000 : f32
    %451 = vector.broadcast %cst_93 : f32 to vector<8x68xf32>
    %452 = arith.select %450, %447, %451 : vector<8x68xi1>, vector<8x68xf32>
    %cst_94 = arith.constant dense<0xFF800000> : vector<8xf32>
    %453 = vector.multi_reduction <maximumf>, %452, %cst_94 [1] : vector<8x68xf32> to vector<8xf32>
    %454 = vector.shape_cast %453 : vector<8xf32> to vector<8x1xf32>
    %455 = vector.broadcast %454 : vector<8x1xf32> to vector<8x68xf32>
    %456 = arith.cmpf oge, %452, %455 : vector<8x68xf32>
    %c48_i32_95 = arith.constant 48 : i32
    %457 = vector.broadcast %c48_i32_95 : i32 to vector<8x68xi32>
    %458 = arith.subi %329, %457 : vector<8x68xi32>
    %c20_i32_96 = arith.constant 20 : i32
    %459 = vector.broadcast %c20_i32_96 : i32 to vector<8x68xi32>
    %460 = arith.select %456, %458, %459 : vector<8x68xi1>, vector<8x68xi32>
    %cst_97 = arith.constant dense<2147483647> : vector<8xi32>
    %461 = vector.multi_reduction <minsi>, %460, %cst_97 [1] : vector<8x68xi32> to vector<8xi32>
    %462 = vector.shape_cast %461 : vector<8xi32> to vector<8x1xi32>
    %c2_i32 = arith.constant 2 : i32
    %463 = vector.broadcast %c2_i32 : i32 to vector<8x5xi32>
    %464 = arith.cmpi eq, %330, %463 : vector<8x5xi32>
    %465 = vector.shape_cast %462 : vector<8x1xi32> to vector<8x1xi32>
    %466 = vector.broadcast %465 : vector<8x1xi32> to vector<8x5xi32>
    %467 = arith.select %464, %466, %420 : vector<8x5xi1>, vector<8x5xi32>
    %468 = vector.broadcast %462 : vector<8x1xi32> to vector<8x20xi32>
    %469 = arith.cmpi eq, %328, %468 : vector<8x20xi32>
    %470 = arith.extui %469 : vector<8x20xi1> to vector<8x20xi32>
    %471 = arith.sitofp %470 : vector<8x20xi32> to vector<8x20xf32>
    %cst_98 = arith.constant dense<0.000000e+00> : vector<8x48xf32>
    %472 = tpu.matmul %471, %6, %cst_98 {dimension_numbers = #tpu.dot_dimension_numbers<[1], [0], [0], [1], [0, 0, 1, 1], [], []>} : vector<8x20xf32>, vector<20x48xf32>, vector<8x48xf32> -> vector<8x48xf32>
    %473 = arith.addf %321, %472 : vector<8x48xf32>
    %474 = arith.addf %473, %448 : vector<8x48xf32>
    %475 = arith.negf %474 : vector<8x48xf32>
    %476 = math.exp %475 : vector<8x48xf32>
    %cst_99 = arith.constant 1.000000e+00 : f32
    %477 = vector.broadcast %cst_99 : f32 to vector<8x48xf32>
    %478 = arith.addf %477, %476 : vector<8x48xf32>
    %479 = arith.divf %477, %478 : vector<8x48xf32>
    %480 = vector.extract_strided_slice %479 {offsets = [0, 0], sizes = [8, 16], strides = [1, 1]} : vector<8x48xf32> to vector<8x16xf32>
    %481 = vector.extract_strided_slice %479 {offsets = [0, 16], sizes = [8, 16], strides = [1, 1]} : vector<8x48xf32> to vector<8x16xf32>
    %482 = vector.extract_strided_slice %473 {offsets = [0, 32], sizes = [8, 16], strides = [1, 1]} : vector<8x48xf32> to vector<8x16xf32>
    %483 = vector.extract_strided_slice %448 {offsets = [0, 32], sizes = [8, 16], strides = [1, 1]} : vector<8x48xf32> to vector<8x16xf32>
    %484 = arith.mulf %480, %483 : vector<8x16xf32>
    %485 = arith.addf %482, %484 : vector<8x16xf32>
    %486 = math.tanh %485 : vector<8x16xf32>
    %cst_100 = arith.constant 1.000000e+00 : f32
    %487 = vector.broadcast %cst_100 : f32 to vector<8x16xf32>
    %488 = arith.subf %487, %481 : vector<8x16xf32>
    %489 = arith.mulf %488, %486 : vector<8x16xf32>
    %490 = arith.mulf %481, %444 : vector<8x16xf32>
    %491 = arith.addf %489, %490 : vector<8x16xf32>
    %cst_101 = arith.constant dense<0.000000e+00> : vector<8x68xf32>
    %492 = tpu.matmul %491, %8, %cst_101 {dimension_numbers = #tpu.dot_dimension_numbers<[1], [0], [0], [1], [0, 0, 1, 1], [], []>} : vector<8x16xf32>, vector<16x68xf32>, vector<8x68xf32> -> vector<8x68xf32>
    %493 = vector.broadcast %9 : vector<1x68xf32> to vector<8x68xf32>
    %494 = arith.addf %492, %493 : vector<8x68xf32>
    %495 = vector.extract_strided_slice %494 {offsets = [0, 0], sizes = [8, 48], strides = [1, 1]} : vector<8x68xf32> to vector<8x48xf32>
    %c48_i32_102 = arith.constant 48 : i32
    %496 = vector.broadcast %c48_i32_102 : i32 to vector<8x68xi32>
    %497 = arith.cmpi sge, %329, %496 : vector<8x68xi32>
    %cst_103 = arith.constant 0xFF800000 : f32
    %498 = vector.broadcast %cst_103 : f32 to vector<8x68xf32>
    %499 = arith.select %497, %494, %498 : vector<8x68xi1>, vector<8x68xf32>
    %cst_104 = arith.constant dense<0xFF800000> : vector<8xf32>
    %500 = vector.multi_reduction <maximumf>, %499, %cst_104 [1] : vector<8x68xf32> to vector<8xf32>
    %501 = vector.shape_cast %500 : vector<8xf32> to vector<8x1xf32>
    %502 = vector.broadcast %501 : vector<8x1xf32> to vector<8x68xf32>
    %503 = arith.cmpf oge, %499, %502 : vector<8x68xf32>
    %c48_i32_105 = arith.constant 48 : i32
    %504 = vector.broadcast %c48_i32_105 : i32 to vector<8x68xi32>
    %505 = arith.subi %329, %504 : vector<8x68xi32>
    %c20_i32_106 = arith.constant 20 : i32
    %506 = vector.broadcast %c20_i32_106 : i32 to vector<8x68xi32>
    %507 = arith.select %503, %505, %506 : vector<8x68xi1>, vector<8x68xi32>
    %cst_107 = arith.constant dense<2147483647> : vector<8xi32>
    %508 = vector.multi_reduction <minsi>, %507, %cst_107 [1] : vector<8x68xi32> to vector<8xi32>
    %509 = vector.shape_cast %508 : vector<8xi32> to vector<8x1xi32>
    %c3_i32 = arith.constant 3 : i32
    %510 = vector.broadcast %c3_i32 : i32 to vector<8x5xi32>
    %511 = arith.cmpi eq, %330, %510 : vector<8x5xi32>
    %512 = vector.shape_cast %509 : vector<8x1xi32> to vector<8x1xi32>
    %513 = vector.broadcast %512 : vector<8x1xi32> to vector<8x5xi32>
    %514 = arith.select %511, %513, %467 : vector<8x5xi1>, vector<8x5xi32>
    %515 = vector.broadcast %509 : vector<8x1xi32> to vector<8x20xi32>
    %516 = arith.cmpi eq, %328, %515 : vector<8x20xi32>
    %517 = arith.extui %516 : vector<8x20xi1> to vector<8x20xi32>
    %518 = arith.sitofp %517 : vector<8x20xi32> to vector<8x20xf32>
    %cst_108 = arith.constant dense<0.000000e+00> : vector<8x48xf32>
    %519 = tpu.matmul %518, %6, %cst_108 {dimension_numbers = #tpu.dot_dimension_numbers<[1], [0], [0], [1], [0, 0, 1, 1], [], []>} : vector<8x20xf32>, vector<20x48xf32>, vector<8x48xf32> -> vector<8x48xf32>
    %520 = arith.addf %321, %519 : vector<8x48xf32>
    %521 = arith.addf %520, %495 : vector<8x48xf32>
    %522 = arith.negf %521 : vector<8x48xf32>
    %523 = math.exp %522 : vector<8x48xf32>
    %cst_109 = arith.constant 1.000000e+00 : f32
    %524 = vector.broadcast %cst_109 : f32 to vector<8x48xf32>
    %525 = arith.addf %524, %523 : vector<8x48xf32>
    %526 = arith.divf %524, %525 : vector<8x48xf32>
    %527 = vector.extract_strided_slice %526 {offsets = [0, 0], sizes = [8, 16], strides = [1, 1]} : vector<8x48xf32> to vector<8x16xf32>
    %528 = vector.extract_strided_slice %526 {offsets = [0, 16], sizes = [8, 16], strides = [1, 1]} : vector<8x48xf32> to vector<8x16xf32>
    %529 = vector.extract_strided_slice %520 {offsets = [0, 32], sizes = [8, 16], strides = [1, 1]} : vector<8x48xf32> to vector<8x16xf32>
    %530 = vector.extract_strided_slice %495 {offsets = [0, 32], sizes = [8, 16], strides = [1, 1]} : vector<8x48xf32> to vector<8x16xf32>
    %531 = arith.mulf %527, %530 : vector<8x16xf32>
    %532 = arith.addf %529, %531 : vector<8x16xf32>
    %533 = math.tanh %532 : vector<8x16xf32>
    %cst_110 = arith.constant 1.000000e+00 : f32
    %534 = vector.broadcast %cst_110 : f32 to vector<8x16xf32>
    %535 = arith.subf %534, %528 : vector<8x16xf32>
    %536 = arith.mulf %535, %533 : vector<8x16xf32>
    %537 = arith.mulf %528, %491 : vector<8x16xf32>
    %538 = arith.addf %536, %537 : vector<8x16xf32>
    %cst_111 = arith.constant dense<0.000000e+00> : vector<8x68xf32>
    %539 = tpu.matmul %538, %8, %cst_111 {dimension_numbers = #tpu.dot_dimension_numbers<[1], [0], [0], [1], [0, 0, 1, 1], [], []>} : vector<8x16xf32>, vector<16x68xf32>, vector<8x68xf32> -> vector<8x68xf32>
    %540 = vector.broadcast %9 : vector<1x68xf32> to vector<8x68xf32>
    %541 = arith.addf %539, %540 : vector<8x68xf32>
    %c48_i32_112 = arith.constant 48 : i32
    %542 = vector.broadcast %c48_i32_112 : i32 to vector<8x68xi32>
    %543 = arith.cmpi sge, %329, %542 : vector<8x68xi32>
    %cst_113 = arith.constant 0xFF800000 : f32
    %544 = vector.broadcast %cst_113 : f32 to vector<8x68xf32>
    %545 = arith.select %543, %541, %544 : vector<8x68xi1>, vector<8x68xf32>
    %cst_114 = arith.constant dense<0xFF800000> : vector<8xf32>
    %546 = vector.multi_reduction <maximumf>, %545, %cst_114 [1] : vector<8x68xf32> to vector<8xf32>
    %547 = vector.shape_cast %546 : vector<8xf32> to vector<8x1xf32>
    %548 = vector.broadcast %547 : vector<8x1xf32> to vector<8x68xf32>
    %549 = arith.cmpf oge, %545, %548 : vector<8x68xf32>
    %c48_i32_115 = arith.constant 48 : i32
    %550 = vector.broadcast %c48_i32_115 : i32 to vector<8x68xi32>
    %551 = arith.subi %329, %550 : vector<8x68xi32>
    %c20_i32_116 = arith.constant 20 : i32
    %552 = vector.broadcast %c20_i32_116 : i32 to vector<8x68xi32>
    %553 = arith.select %549, %551, %552 : vector<8x68xi1>, vector<8x68xi32>
    %cst_117 = arith.constant dense<2147483647> : vector<8xi32>
    %554 = vector.multi_reduction <minsi>, %553, %cst_117 [1] : vector<8x68xi32> to vector<8xi32>
    %555 = vector.shape_cast %554 : vector<8xi32> to vector<8x1xi32>
    %c4_i32 = arith.constant 4 : i32
    %556 = vector.broadcast %c4_i32 : i32 to vector<8x5xi32>
    %557 = arith.cmpi eq, %330, %556 : vector<8x5xi32>
    %558 = vector.shape_cast %555 : vector<8x1xi32> to vector<8x1xi32>
    %559 = vector.broadcast %558 : vector<8x1xi32> to vector<8x5xi32>
    %560 = arith.select %557, %559, %514 : vector<8x5xi1>, vector<8x5xi32>
    %c0_118 = arith.constant 0 : index
    %c0_119 = arith.constant 0 : index
    %561 = vector.load %arg11[%c0_118, %c0_119] : memref<8x5xi32, #tpu.memory_space<vmem>>, vector<8x5xi32>
    tpu.vector_store %arg11[%c0_118, %c0_119], %560 {strides = array<i32>} : memref<8x5xi32, #tpu.memory_space<vmem>>, vector<8x5xi32>,
    return
  }
}

</mosaic_0001>

<bundles_post_ra>
// kernel: banet_pallas.1
= control target key start
LH: loop header
LB: loop body
LE: loop exit
PB: predicated region body
PF: predicated region fallthrough
CT: control target
= control target key end

     0   :  { %18 = vsyncpa [#allocation3], 0  ;;  %vm75_vm0 = vcmask 261120   ;;  %v3117_v2 = vmov 0.0   ;;  %s3734_s0 = inlined_call_operand.vmem [shape: f32[6,8,32], index: 0, kind: input, shape index: {}]   ;;  %s3735_s1 = inlined_call_operand.vmem [shape: f32[32,65], index: 1, kind: input, shape index: {}]   ;;  %s3736_s2 = inlined_call_operand.vmem [shape: f32[1,65], index: 2, kind: input, shape index: {}]   ;;  %s3737_s3 = inlined_call_operand.vmem [shape: f32[16,65], index: 3, kind: input, shape index: {}]   ;;  %s3738_s4 = inlined_call_operand.vmem [shape: f32[32,64], index: 4, kind: input, shape index: {}]   ;;  %s3739_s5 = inlined_call_operand.vmem [shape: f32[16,48], index: 5, kind: input, shape index: {}]   ;;  %s3740_s6 = inlined_call_operand.vmem [shape: f32[1,48], index: 6, kind: input, shape index: {}]   ;;  %s3741_s7 = inlined_call_operand.vmem [shape: f32[20,48], index: 7, kind: input, shape index: {}]   ;;  %s3742_s8 = inlined_call_operand.vmem [shape: f32[1,48], index: 8, kind: input, shape index: {}]   ;;  %s3743_s9 = inlined_call_operand.vmem [shape: f32[16,68], index: 9, kind: input, shape index: {}]   ;;  %s3744_s10 = inlined_call_operand.vmem [shape: f32[1,68], index: 10, kind: input, shape index: {}]   ;;  %s3745_s11 = inlined_call_operand.hbm [shape: s32[8,5], index: 11, kind: output, shape index: {0}]   ;;  %s3746_s12 = inlined_call_operand.hbm [shape: f32[8,16], index: 12, kind: output, shape index: {1}]  }
   0x1   :  { %v45_v0 = vld [vmem:[%s3735_s1 + $0x18] sm:$0xff]  ;;  %v44_v1 = vld [vmem:[%s3735_s1 + $0x10] sm:$0xff]  ;;  %2749 = vmatprep.subr.mxu1 %v3117_v2  ;;  %v63_v3 = vld [vmem:[%s3734_s0] sm:$0xff] }
   0x2   :  { %2732 = vmatprep.subr.mxu0 %v45_v0  ;;  %v3205_v4 = vld [vmem:[%s3737_s3 + $0x8] sm:$0xff]  ;;  %2740 = vmatprep.mubr.msk.f32.mxu0 %vm75_vm0, %v63_v3  ;;  %v3214_v6 = vld [vmem:[%s3737_s3] sm:$0xff] }
   0x3   :  { %2733 = vmatpush3.msra.mxu0 %v45_v0  ;;  %v43_v5 = vld [vmem:[%s3735_s1 + $0x8] sm:$0xff] }
   0x4   :  { %19 = vsyncpa [#allocation5], 0  ;;  %2734 = vmatprep.subr.mxu0 %v44_v1  ;;  %2750 = vmatpush3.msra.mxu1 %v3205_v4  ;;  %v42_v7 = vld [vmem:[%s3735_s1] sm:$0xff]  ;;  %v64_v8 = vld [vmem:[%s3734_s0 + $0x8] sm:$0xff]  ;;  %vm3118_vm1 = vmmov 0   ;;  %v3119_v9 = vmov 64  }
   0x5   :  { %2735 = vmatpush3.msra.mxu0 %v44_v1  ;;  %2751 = vmatprep.subr.mxu1 %v3117_v2  ;;  %v3238_v13 = vld [vmem:[%s3736_s2] ss:$0 sm:$0xff]  ;;  %s3120_s19 = smov 96   ;;  %s3121_s2 = smov 16   ;;  %v3250_v29 = vld [vmem:[%s3738_s4 + $0x18] sm:$0xff]  ;;  %v3255_v30 = vld [vmem:[%s3738_s4 + $0x10] sm:$0xff] }
   0x6   :  { %2736 = vmatprep.subr.mxu0 %v43_v5  ;;  %2752 = vmatpush3.msra.mxu1 %v3214_v6  ;;  %v3263_v31 = vld [vmem:[%s3738_s4 + $0x8] sm:$0xff]  ;;  %v3272_v33 = vld [vmem:[%s3738_s4] sm:$0xff]  ;;  %s3122_s28 = smov 32   ;;  %s3123_s4 = smov 80   ;;  %vm189_vm3 = vcmask 130048   ;;  %vm1714_vm10 = vcmask 556032  }
   0x7   :  { %2737 = vmatpush3.msra.mxu0 %v43_v5  ;;  %2753 = vmatprep.mubr.msk.f32.mxu1 %vm3118_vm1, %v3117_v2  ;;  %s3124_s26 = smov 112   ;;  %vm1745_vm13 = vcmask 1043456   ;;  %vm1741_vm14 = vcmask 162816  }
   0x8   :  { %2738 = vmatprep.subr.mxu0 %v42_v7  ;;  %2754 = vmatmul.mubr.f32.vlgmr.msra.gmra.mxu1 %v3117_v2 }
   0x9   :  { %2739 = vmatpush3.msra.mxu0 %v42_v7  ;;  %2756 = vmatprep.subr.mxu1 %v3117_v2 }
   0xa   :  { %2741 = vmatmul.mubr.msk.f32.vlgmr.msra.gmra.mxu0 %vm75_vm0, %v64_v8  ;;  %2764 = vmatprep.mubr.msk.f32.mxu1 %vm3118_vm1, %v3117_v2 }
   0xb   :  { %2774 = vmatprep.subr.mxu0 %v3117_v2  ;;  %2945 = vset.pattern.permute.xlu1 %v3119_v9 }
   0xc   :  { %2946 = vset.pattern.permute.xlu0 %v3119_v9  ;;  %2757 = vmatpush3.msra.mxu1 %v3250_v29 }
   0xd   :  { %2775 = vmatpush3.msra.mxu0 %v3250_v29  ;;  %2758 = vmatprep.subr.mxu1 %v3117_v2 }
   0xe   :  { %2776 = vmatprep.subr.mxu0 %v3117_v2  ;;  %2759 = vmatpush3.msra.mxu1 %v3255_v30 }
   0xf   :  { %2777 = vmatpush3.msra.mxu0 %v3255_v30  ;;  %2760 = vmatprep.subr.mxu1 %v3117_v2 }
  0x10   :  { %2778 = vmatprep.subr.mxu0 %v3117_v2  ;;  %2761 = vmatpush3.msra.mxu1 %v3263_v31 }
  0x11   :  { %2762 = vmatprep.subr.mxu1 %v3117_v2  ;;  %2779 = vmatpush3.msra.mxu0 %v3263_v31 }
  0x12   :  { %2763 = vmatpush3.msra.mxu1 %v3272_v33  ;;  %2780 = vmatprep.subr.mxu0 %v3117_v2 }
  0x13   :  { %2767 = vmatprep.subr.mxu1 %v3117_v2  ;;  %2781 = vmatpush3.msra.mxu0 %v3272_v33 }
  0x14   :  { %2792 = vmatprep.subr.mxu0 %v3117_v2 }
  0xc8   :  { %v259_v10 = vpop.f32.mrf.mxu1 }
  0xca   :  { %v3233_v11 = vpop.f32.mrf.mxu0  ;;  %v2755_v12 = vpop.f32.mrf.mxu1 }
  0xcb   :  { %v166_v45 = vadd.f32 %v3233_v11, %v3238_v13  ;;  %v65_v11 = vld [vmem:[%s3734_s0 + $0x10] sm:$0xff]  ;;  %v66_v12 = vld [vmem:[%s3734_s0 + $0x18] sm:$0xff] }
  0xcc   :  { %v160_v14 = vpop.f32.mrf.mxu0  ;;  %2743 = vmatprep.mubr.msk.f32.mxu0 %vm75_vm0, %v65_v11 }
  0xcd   :  { %v161_v15 = vadd.f32 %v3238_v13, %v160_v14  ;;  %2744 = vmatmul.mubr.msk.f32.gmra.mxu0 %vm75_vm0, %v66_v12 }
  0xcf   :  { %v263_v16 = vadd.f32 %v259_v10, %v161_v15 }
  0xd1   :  { %v2584_v17 = vmul.f32 -1.442695, %v263_v16  ;;  %2947 = vtanh.f32 %v263_v16  ;;  %v67_v16 = vld [vmem:[%s3734_s0 + $0x20] sm:$0xff] }
  0xd2   :  { %2746 = vmatprep.mubr.msk.f32.mxu0 %vm75_vm0, %v67_v16 }
  0xd3   :  { %2949 = vpow2.f32 %v2584_v17  ;;  %v68_v17 = vld [vmem:[%s3734_s0 + $0x28] sm:$0xff] }
  0xd4   :  { %2747 = vmatmul.mubr.msk.f32.gmra.mxu0 %vm75_vm0, %v68_v17 }
  0xd5   :  { %2782 = vmatprep.mubr.msk.f32.mxu0 %vm3118_vm1, %v3117_v2 }
  0xde   :  { %v2948_v18 = vpop.eup %2947 }
  0xdf   :  { %276 = vrot.lane.b32.xlu0 %v2948_v18, %s3120_s19 }
  0xe0   :  { %v2950_v19 = vpop.eup %2949 }
  0xe1   :  { %v267_v20 = vadd.f32 1.0, %v2950_v19 }
  0xe3   :  { %2951 = vrcp.f32 %v267_v20 }
  0xf0   :  { %v2952_v21 = vpop.eup %2951 }
  0xf1   :  { %vm271_vm2 = vcmp.gt.f32.partialorder %v2952_v21, 0.5  ;;  %v274_v26 = vmul.f32 0.0, %v2952_v21 }
  0xf2   :  { %v2585_v22 = vsel %vm271_vm2, 1.0, %v3117_v2 }
  0xf3   :  { %293 = vperm.xlu1 %2945, %v2585_v22   ;;  %v399_v25 = vsub.f32 1.0, %v2585_v22 }
 0x151   :  { %v277_v23 = vpop.permute.xlu0 %276 }
 0x152   :  { %v279_v24 = vmul.f32 %v2952_v21, %v277_v23 }
 0x154   :  { %281 = vrot.lane.b32.xlu0 %v279_v24, %s3121_s2 }
 0x158   :  { %402 = vperm.xlu0 %2946, %v399_v25  }
 0x16e   :  { %v294_v34 = vpop.permute.xlu1 %293 }
 0x1c6   :  { %v282_v27 = vpop.permute.xlu0 %281 }
 0x1c7   :  { %v3244_v28 = vadd.f32 %v282_v27, %v274_v26 }
 0x1c9   :  { %2953 = vtanh.f32 %v3244_v28 }
 0x1d3   :  { %v403_v38 = vpop.permute.xlu0 %402 }
 0x1d4   :  { %v406_v1 = vmul.f32 %v403_v38, %v3244_v28 }
 0x1d6   :  { %v2954_v32 = vpop.eup %2953 }
 0x1d7   :  { %287 = vrot.lane.b32.xlu1 %v2954_v32, %s3122_s28 }
 0x249   :  { %v288_v35 = vpop.permute.xlu1 %287 }
 0x24a   :  { %v290_v36 = vmul.f32 %v2952_v21, %v288_v35 }
 0x24c   :  { %v296_v37 = vmul.f32 %v294_v34, %v290_v36  ;;  %v405_v39 = vmul.f32 %v403_v38, %v290_v36  ;;  %v3360_v34 = vpop.f32.mrf.mxu0 }
 0x24e   :  { %298 = vrot.lane.b32.xlu1 %v296_v37, %s3123_s4  ;;  %v170_v35 = vpop.f32.mrf.mxu0 }
 0x24f   :  { %v171_v37 = vadd.f32 %v3238_v13, %v170_v35 }
 0x250   :  { %v3362_v36 = vpop.f32.mrf.mxu0 }
 0x252   :  { %408 = vrot.lane.b32.xlu1 %v405_v39, %s3123_s4 }
 0x2c0   :  { %v299_v40 = vpop.permute.xlu1 %298 }
 0x2c1   :  { %v301_v41 = vsel %vm189_vm3, %v299_v40, 0.0  ;;  %v3365_v40 = vpop.f32.mrf.mxu0 }
 0x2c2   :  { %2765 = vmatmul.mubr.msk.f32.vlgmr.msra.gmra.mxu1 %vm75_vm0, %v301_v41 }
 0x2c3   :  { %2768 = vmatpush3.msra.mxu1 %v3205_v4  ;;  %2771 = vmatprep.mubr.msk.f32.mxu1 %vm3118_vm1, %v3117_v2 }
 0x2c4   :  { %2769 = vmatprep.subr.mxu1 %v3117_v2  ;;  %v409_v42 = vpop.permute.xlu1 %408 }
 0x2c5   :  { %2770 = vmatpush3.msra.mxu1 %v3214_v6 }
 0x2c6   :  { %2772 = vmatmul.mubr.msk.f32.vlgmr.msra.gmra.mxu1 %vm189_vm3, %v409_v42  ;;  %2785 = vmatprep.subr.mxu1 %v3117_v2 }
 0x2c7   :  { %2786 = vmatpush3.msra.mxu1 %v3205_v4  ;;  %2789 = vmatprep.mubr.msk.f32.mxu1 %vm3118_vm1, %v3117_v2 }
 0x2c8   :  { %2787 = vmatprep.subr.mxu1 %v3117_v2 }
 0x2c9   :  { %2788 = vmatpush3.msra.mxu1 %v3214_v6 }
 0x2ca   :  { %2803 = vmatprep.subr.mxu1 %v3117_v2 }
 0x382   :  { %v371_v43 = vpop.f32.mrf.mxu1 }
 0x383   :  { %2955 = vtanh.f32 %v371_v43  ;;  %v2587_v51 = vmul.f32 -1.442695, %v371_v43 }
 0x384   :  { %v2766_v44 = vpop.f32.mrf.mxu1 }
 0x386   :  { %v478_v46 = vpop.f32.mrf.mxu1 }
 0x387   :  { %v482_v47 = vadd.f32 %v478_v46, %v166_v45 }
 0x388   :  { %v2773_v48 = vpop.f32.mrf.mxu1 }
 0x389   :  { %2957 = vtanh.f32 %v482_v47  ;;  %v2589_v52 = vmul.f32 -1.442695, %v482_v47 }
 0x38a   :  { %2959 = vpow2.f32 %v2587_v51 }
 0x38b   :  { %2961 = vpow2.f32 %v2589_v52 }
 0x390   :  { %v2956_v49 = vpop.eup %2955 }
 0x391   :  { %384 = vrot.lane.b32.xlu1 %v2956_v49, %s3120_s19 }
 0x396   :  { %v2958_v50 = vpop.eup %2957 }
 0x397   :  { %495 = vrot.lane.b32.xlu0 %v2958_v50, %s3120_s19  ;;  %v2960_v53 = vpop.eup %2959 }
 0x398   :  { %v2962_v54 = vpop.eup %2961  ;;  %v378_v55 = vadd.f32 1.0, %v2960_v53 }
 0x399   :  { %v486_v56 = vadd.f32 1.0, %v2962_v54 }
 0x39a   :  { %2963 = vrcp.f32 %v378_v55 }
 0x39b   :  { %2965 = vrcp.f32 %v486_v56 }
 0x3a7   :  { %v2964_v57 = vpop.eup %2963 }
 0x3a8   :  { %v2966_v60 = vpop.eup %2965  ;;  %v382_v8 = vmul.f32 0.0, %v2964_v57 }
 0x3a9   :  { %vm490_vm4 = vcmp.gt.f32.partialorder %v2966_v60, 0.5  ;;  %v493_v3 = vmul.f32 %v2966_v60, %v406_v1 }
 0x3aa   :  { %v2590_v63 = vsel %vm490_vm4, 1.0, %v3117_v2 }
 0x3ab   :  { %v622_v0 = vsub.f32 1.0, %v2590_v63 }
 0x403   :  { %v385_v58 = vpop.permute.xlu1 %384 }
 0x404   :  { %v387_v59 = vmul.f32 %v2964_v57, %v385_v58 }
 0x406   :  { %389 = vrot.lane.b32.xlu1 %v387_v59, %s3121_s2 }
 0x409   :  { %v496_v61 = vpop.permute.xlu0 %495 }
 0x40a   :  { %v498_v62 = vmul.f32 %v2966_v60, %v496_v61 }
 0x40c   :  { %500 = vrot.lane.b32.xlu0 %v498_v62, %s3121_s2 }
 0x410   :  { %625 = vperm.xlu0 %2946, %v622_v0  }
 0x414   :  { %512 = vperm.xlu0 %2946, %v2590_v63  }
 0x478   :  { %v390_v5 = vpop.permute.xlu1 %389 }
 0x479   :  { %v3311_v10 = vadd.f32 %v390_v5, %v382_v8 }
 0x47e   :  { %v501_v7 = vpop.permute.xlu0 %500 }
 0x47f   :  { %v3309_v9 = vadd.f32 %v501_v7, %v493_v3 }
 0x481   :  { %2967 = vtanh.f32 %v3309_v9 }
 0x482   :  { %2969 = vtanh.f32 %v3311_v10 }
 0x48b   :  { %v3335_v18 = vpop.permute.xlu0 %625 }
 0x48e   :  { %v2968_v14 = vpop.eup %2967 }
 0x48f   :  { %506 = vrot.lane.b32.xlu1 %v2968_v14, %s3122_s28  ;;  %v2970_v15 = vpop.eup %2969  ;;  %v513_v21 = vpop.permute.xlu0 %512 }
 0x493   :  { %395 = vrot.lane.b32.xlu1 %v2970_v15, %s3122_s28 }
 0x501   :  { %v507_v19 = vpop.permute.xlu1 %506 }
 0x502   :  { %v509_v20 = vmul.f32 %v2966_v60, %v507_v19  ;;  %v629_v60 = vmul.f32 %v3335_v18, %v3309_v9 }
 0x504   :  { %v515_v22 = vmul.f32 %v513_v21, %v509_v20  ;;  %v628_v23 = vmul.f32 %v3335_v18, %v509_v20  ;;  %v176_v21 = vadd.f32 %v3360_v34, %v3238_v13 }
 0x505   :  { %v396_v24 = vpop.permute.xlu1 %395 }
 0x506   :  { %631 = vrot.lane.b32.xlu0 %v628_v23, %s3123_s4  ;;  %517 = vrot.lane.b32.xlu1 %v515_v22, %s3123_s4  ;;  %v398_v25 = vmul.f32 %v2964_v57, %v396_v24 }
 0x50a   :  { %521 = vrot.lane.b32.xlu0 %v398_v25, %s3120_s19 }
 0x578   :  { %v632_v26 = vpop.permute.xlu0 %631  ;;  %v518_v27 = vpop.permute.xlu1 %517 }
 0x579   :  { %2790 = vmatmul.mubr.msk.f32.vlgmr.msra.gmra.mxu1 %vm189_vm3, %v632_v26 }
 0x57a   :  { %2804 = vmatpush3.msra.mxu1 %v3205_v4  ;;  %2807 = vmatprep.mubr.msk.f32.mxu1 %vm3118_vm1, %v3117_v2 }
 0x57b   :  { %2805 = vmatprep.subr.mxu1 %v3117_v2 }
 0x57c   :  { %v522_v28 = vpop.permute.xlu0 %521  ;;  %2806 = vmatpush3.msra.mxu1 %v3214_v6 }
 0x57d   :  { %v524_v32 = vsel %vm189_vm3, %v518_v27, %v522_v28  ;;  %2810 = vmatprep.subr.mxu1 %v3117_v2 }
 0x57e   :  { %2783 = vmatmul.mubr.msk.f32.vlgmr.msra.gmra.mxu0 %vm75_vm0, %v524_v32 }
 0x57f   :  { %2793 = vmatpush3.msra.mxu0 %v3250_v29  ;;  %2800 = vmatprep.mubr.msk.f32.mxu0 %vm3118_vm1, %v3117_v2 }
 0x580   :  { %2794 = vmatprep.subr.mxu0 %v3117_v2 }
 0x581   :  { %2795 = vmatpush3.msra.mxu0 %v3255_v30 }
 0x582   :  { %2796 = vmatprep.subr.mxu0 %v3117_v2 }
 0x583   :  { %2797 = vmatpush3.msra.mxu0 %v3263_v31 }
 0x584   :  { %2798 = vmatprep.subr.mxu0 %v3117_v2 }
 0x585   :  { %2799 = vmatpush3.msra.mxu0 %v3272_v33 }
 0x586   :  { %2821 = vmatprep.subr.mxu0 %v3117_v2 }
 0x639   :  { %v701_v38 = vpop.f32.mrf.mxu1 }
 0x63a   :  { %v705_v39 = vadd.f32 %v701_v38, %v171_v37 }
 0x63b   :  { %v2791_v41 = vpop.f32.mrf.mxu1 }
 0x63c   :  { %2971 = vtanh.f32 %v705_v39  ;;  %v2594_v46 = vmul.f32 -1.442695, %v705_v39 }
 0x63e   :  { %v594_v42 = vpop.f32.mrf.mxu0 }
 0x63f   :  { %2973 = vtanh.f32 %v594_v42  ;;  %v2592_v47 = vmul.f32 -1.442695, %v594_v42 }
 0x640   :  { %v2784_v43 = vpop.f32.mrf.mxu0  ;;  %2975 = vpow2.f32 %v2594_v46 }
 0x641   :  { %2977 = vpow2.f32 %v2592_v47 }
 0x649   :  { %v2972_v44 = vpop.eup %2971 }
 0x64a   :  { %718 = vrot.lane.b32.xlu1 %v2972_v44, %s3120_s19 }
 0x64c   :  { %v2974_v45 = vpop.eup %2973 }
 0x64d   :  { %607 = vrot.lane.b32.xlu0 %v2974_v45, %s3120_s19  ;;  %v2976_v48 = vpop.eup %2975 }
 0x64e   :  { %v709_v49 = vadd.f32 1.0, %v2976_v48  ;;  %v2978_v50 = vpop.eup %2977 }
 0x64f   :  { %v601_v51 = vadd.f32 1.0, %v2978_v50 }
 0x650   :  { %2979 = vrcp.f32 %v709_v49 }
 0x651   :  { %2981 = vrcp.f32 %v601_v51 }
 0x65d   :  { %v2980_v52 = vpop.eup %2979 }
 0x65e   :  { %vm713_vm5 = vcmp.gt.f32.partialorder %v2980_v52, 0.5  ;;  %v2982_v56 = vpop.eup %2981  ;;  %v716_v61 = vmul.f32 %v2980_v52, %v629_v60 }
 0x65f   :  { %v2595_v55 = vsel %vm713_vm5, 1.0, %v3117_v2  ;;  %v605_v0 = vmul.f32 %v2982_v56, %v3311_v10 }
 0x660   :  { %v845_v59 = vsub.f32 1.0, %v2595_v55 }
 0x6bc   :  { %v719_v53 = vpop.permute.xlu1 %718 }
 0x6bd   :  { %v721_v54 = vmul.f32 %v2980_v52, %v719_v53 }
 0x6bf   :  { %v608_v57 = vpop.permute.xlu0 %607  ;;  %723 = vrot.lane.b32.xlu1 %v721_v54, %s3121_s2 }
 0x6c0   :  { %v610_v58 = vmul.f32 %v2982_v56, %v608_v57 }
 0x6c2   :  { %612 = vrot.lane.b32.xlu0 %v610_v58, %s3121_s2 }
 0x6c3   :  { %848 = vperm.xlu1 %2945, %v845_v59  }
 0x6c7   :  { %735 = vperm.xlu1 %2945, %v2595_v55  }
 0x731   :  { %v724_v62 = vpop.permute.xlu1 %723 }
 0x732   :  { %v3374_v63 = vadd.f32 %v724_v62, %v716_v61 }
 0x734   :  { %2983 = vtanh.f32 %v3374_v63  ;;  %v613_v1 = vpop.permute.xlu0 %612 }
 0x735   :  { %v3378_v3 = vadd.f32 %v613_v1, %v605_v0 }
 0x737   :  { %2985 = vtanh.f32 %v3378_v3 }
 0x73e   :  { %v3383_v8 = vpop.permute.xlu1 %848 }
 0x73f   :  { %v852_v49 = vmul.f32 %v3383_v8, %v3374_v63 }
 0x741   :  { %v2984_v5 = vpop.eup %2983 }
 0x742   :  { %729 = vrot.lane.b32.xlu0 %v2984_v5, %s3122_s28  ;;  %v736_v12 = vpop.permute.xlu1 %735 }
 0x744   :  { %v2986_v7 = vpop.eup %2985 }
 0x746   :  { %618 = vrot.lane.b32.xlu0 %v2986_v7, %s3122_s28 }
 0x7b4   :  { %v730_v9 = vpop.permute.xlu0 %729 }
 0x7b5   :  { %v732_v11 = vmul.f32 %v2980_v52, %v730_v9  ;;  %v181_v9 = vadd.f32 %v3238_v13, %v3365_v40 }
 0x7b7   :  { %v738_v14 = vmul.f32 %v736_v12, %v732_v11  ;;  %v851_v10 = vmul.f32 %v3383_v8, %v732_v11 }
 0x7b8   :  { %v619_v15 = vpop.permute.xlu0 %618 }
 0x7b9   :  { %854 = vrot.lane.b32.xlu1 %v851_v10, %s3123_s4  ;;  %740 = vrot.lane.b32.xlu0 %v738_v14, %s3123_s4  ;;  %v621_v16 = vmul.f32 %v2982_v56, %v619_v15 }
 0x7bd   :  { %744 = vrot.lane.b32.xlu1 %v621_v16, %s3120_s19 }
 0x82b   :  { %v855_v17 = vpop.permute.xlu1 %854  ;;  %v741_v18 = vpop.permute.xlu0 %740 }
 0x82c   :  { %2808 = vmatmul.mubr.msk.f32.vlgmr.msra.gmra.mxu1 %vm189_vm3, %v855_v17 }
 0x82d   :  { %2811 = vmatpush3.msra.mxu1 %v3250_v29  ;;  %2818 = vmatprep.mubr.msk.f32.mxu1 %vm3118_vm1, %v3117_v2 }
 0x82e   :  { %2812 = vmatprep.subr.mxu1 %v3117_v2 }
 0x82f   :  { %v745_v19 = vpop.permute.xlu1 %744  ;;  %2813 = vmatpush3.msra.mxu1 %v3255_v30 }
 0x830   :  { %v747_v20 = vsel %vm189_vm3, %v741_v18, %v745_v19  ;;  %2814 = vmatprep.subr.mxu1 %v3117_v2 }
 0x831   :  { %2801 = vmatmul.mubr.msk.f32.vlgmr.msra.gmra.mxu0 %vm75_vm0, %v747_v20  ;;  %2815 = vmatpush3.msra.mxu1 %v3263_v31 }
 0x832   :  { %2822 = vmatpush3.msra.mxu0 %v3205_v4  ;;  %2825 = vmatprep.mubr.msk.f32.mxu0 %vm3118_vm1, %v3117_v2 }
 0x833   :  { %2823 = vmatprep.subr.mxu0 %v3117_v2  ;;  %2816 = vmatprep.subr.mxu1 %v3117_v2 }
 0x834   :  { %2824 = vmatpush3.msra.mxu0 %v3214_v6  ;;  %2817 = vmatpush3.msra.mxu1 %v3272_v33 }
 0x835   :  { %2839 = vmatprep.subr.mxu1 %v3117_v2  ;;  %2828 = vmatprep.subr.mxu0 %v3117_v2 }
 0x8ec   :  { %v924_v22 = vpop.f32.mrf.mxu1 }
 0x8ed   :  { %v928_v23 = vadd.f32 %v924_v22, %v176_v21 }
 0x8ee   :  { %v2809_v24 = vpop.f32.mrf.mxu1 }
 0x8ef   :  { %2987 = vtanh.f32 %v928_v23  ;;  %v2599_v32 = vmul.f32 -1.442695, %v928_v23 }
 0x8f1   :  { %v817_v25 = vpop.f32.mrf.mxu0 }
 0x8f2   :  { %2989 = vtanh.f32 %v817_v25  ;;  %v2597_v35 = vmul.f32 -1.442695, %v817_v25 }
 0x8f3   :  { %v2802_v26 = vpop.f32.mrf.mxu0  ;;  %2991 = vpow2.f32 %v2599_v32 }
 0x8f4   :  { %2993 = vpow2.f32 %v2597_v35 }
 0x8fc   :  { %v2988_v27 = vpop.eup %2987 }
 0x8fd   :  { %941 = vrot.lane.b32.xlu0 %v2988_v27, %s3120_s19 }
 0x8ff   :  { %v2990_v28 = vpop.eup %2989 }
 0x900   :  { %830 = vrot.lane.b32.xlu1 %v2990_v28, %s3120_s19  ;;  %v2992_v37 = vpop.eup %2991 }
 0x901   :  { %v932_v38 = vadd.f32 1.0, %v2992_v37  ;;  %v2994_v34 = vpop.eup %2993 }
 0x902   :  { %v824_v39 = vadd.f32 1.0, %v2994_v34 }
 0x903   :  { %2995 = vrcp.f32 %v932_v38 }
 0x904   :  { %2997 = vrcp.f32 %v824_v39 }
 0x910   :  { %v2996_v41 = vpop.eup %2995 }
 0x911   :  { %vm936_vm6 = vcmp.gt.f32.partialorder %v2996_v41, 0.5  ;;  %v2998_v45 = vpop.eup %2997  ;;  %v939_v50 = vmul.f32 %v2996_v41, %v852_v49 }
 0x912   :  { %v2600_v44 = vsel %vm936_vm6, 1.0, %v3117_v2  ;;  %v828_v53 = vmul.f32 %v2998_v45, %v3378_v3 }
 0x913   :  { %v1068_v48 = vsub.f32 1.0, %v2600_v44 }
 0x96f   :  { %v942_v42 = vpop.permute.xlu0 %941 }
 0x970   :  { %v944_v43 = vmul.f32 %v2996_v41, %v942_v42 }
 0x972   :  { %946 = vrot.lane.b32.xlu0 %v944_v43, %s3121_s2  ;;  %v831_v46 = vpop.permute.xlu1 %830 }
 0x973   :  { %v833_v47 = vmul.f32 %v2998_v45, %v831_v46 }
 0x975   :  { %835 = vrot.lane.b32.xlu1 %v833_v47, %s3121_s2 }
 0x976   :  { %1071 = vperm.xlu0 %2946, %v1068_v48  }
 0x97a   :  { %958 = vperm.xlu0 %2946, %v2600_v44  }
 0x9e4   :  { %v947_v51 = vpop.permute.xlu0 %946 }
 0x9e5   :  { %v3417_v52 = vadd.f32 %v947_v51, %v939_v50 }
 0x9e7   :  { %2999 = vtanh.f32 %v3417_v52  ;;  %v836_v54 = vpop.permute.xlu1 %835 }
 0x9e8   :  { %v3421_v55 = vadd.f32 %v836_v54, %v828_v53 }
 0x9ea   :  { %3001 = vtanh.f32 %v3421_v55 }
 0x9f1   :  { %v3426_v58 = vpop.permute.xlu0 %1071 }
 0x9f2   :  { %v1075_v32 = vmul.f32 %v3426_v58, %v3417_v52 }
 0x9f4   :  { %v3000_v56 = vpop.eup %2999 }
 0x9f5   :  { %952 = vrot.lane.b32.xlu1 %v3000_v56, %s3122_s28  ;;  %v959_v61 = vpop.permute.xlu0 %958 }
 0x9f7   :  { %v3002_v57 = vpop.eup %3001 }
 0x9f9   :  { %841 = vrot.lane.b32.xlu1 %v3002_v57, %s3122_s28 }
 0xa67   :  { %v953_v59 = vpop.permute.xlu1 %952 }
 0xa68   :  { %v955_v60 = vmul.f32 %v2996_v41, %v953_v59 }
 0xa6a   :  { %v961_v62 = vmul.f32 %v959_v61, %v955_v60  ;;  %v1074_v63 = vmul.f32 %v3426_v58, %v955_v60 }
 0xa6b   :  { %v842_v0 = vpop.permute.xlu1 %841 }
 0xa6c   :  { %1077 = vrot.lane.b32.xlu0 %v1074_v63, %s3123_s4  ;;  %963 = vrot.lane.b32.xlu1 %v961_v62, %s3123_s4  ;;  %v844_v1 = vmul.f32 %v2998_v45, %v842_v0 }
 0xa70   :  { %967 = vrot.lane.b32.xlu0 %v844_v1, %s3120_s19 }
 0xade   :  { %v1078_v3 = vpop.permute.xlu0 %1077  ;;  %v964_v5 = vpop.permute.xlu1 %963 }
 0xadf   :  { %2826 = vmatmul.mubr.msk.f32.vlgmr.msra.gmra.mxu0 %vm189_vm3, %v1078_v3 }
 0xae0   :  { %2829 = vmatpush3.msra.mxu0 %v3250_v29  ;;  %2836 = vmatprep.mubr.msk.f32.mxu0 %vm3118_vm1, %v3117_v2 }
 0xae1   :  { %2830 = vmatprep.subr.mxu0 %v3117_v2 }
 0xae2   :  { %v968_v7 = vpop.permute.xlu0 %967  ;;  %2831 = vmatpush3.msra.mxu0 %v3255_v30 }
 0xae3   :  { %v970_v8 = vsel %vm189_vm3, %v964_v5, %v968_v7  ;;  %2832 = vmatprep.subr.mxu0 %v3117_v2 }
 0xae4   :  { %2819 = vmatmul.mubr.msk.f32.vlgmr.msra.gmra.mxu1 %vm75_vm0, %v970_v8  ;;  %2833 = vmatpush3.msra.mxu0 %v3263_v31 }
 0xae5   :  { %2840 = vmatpush3.msra.mxu1 %v3205_v4  ;;  %2843 = vmatprep.mubr.msk.f32.mxu1 %vm3118_vm1, %v3117_v2 }
 0xae6   :  { %2841 = vmatprep.subr.mxu1 %v3117_v2  ;;  %2834 = vmatprep.subr.mxu0 %v3117_v2 }
 0xae7   :  { %2842 = vmatpush3.msra.mxu1 %v3214_v6  ;;  %2835 = vmatpush3.msra.mxu0 %v3272_v33 }
 0xae8   :  { %2846 = vmatprep.subr.mxu1 %v3117_v2  ;;  %2857 = vmatprep.subr.mxu0 %v3117_v2 }
 0xb9f   :  { %v1147_v11 = vpop.f32.mrf.mxu0 }
 0xba0   :  { %v1151_v4 = vadd.f32 %v1147_v11, %v181_v9 }
 0xba1   :  { %v2827_v12 = vpop.f32.mrf.mxu0 }
 0xba2   :  { %3003 = vtanh.f32 %v1151_v4  ;;  %v2604_v16 = vmul.f32 -1.442695, %v1151_v4 }
 0xba4   :  { %v1040_v14 = vpop.f32.mrf.mxu1 }
 0xba5   :  { %3005 = vtanh.f32 %v1040_v14  ;;  %v2602_v17 = vmul.f32 -1.442695, %v1040_v14 }
 0xba6   :  { %v2820_v10 = vpop.f32.mrf.mxu1  ;;  %3007 = vpow2.f32 %v2604_v16 }
 0xba7   :  { %3009 = vpow2.f32 %v2602_v17 }
 0xbaf   :  { %v3004_v15 = vpop.eup %3003 }
 0xbb0   :  { %1164 = vrot.lane.b32.xlu1 %v3004_v15, %s3120_s19 }
 0xbb2   :  { %v3006_v6 = vpop.eup %3005 }
 0xbb3   :  { %1053 = vrot.lane.b32.xlu0 %v3006_v6, %s3120_s19  ;;  %v3008_v18 = vpop.eup %3007 }
 0xbb4   :  { %v1155_v19 = vadd.f32 1.0, %v3008_v18  ;;  %v3010_v40 = vpop.eup %3009 }
 0xbb5   :  { %v1047_v20 = vadd.f32 1.0, %v3010_v40 }
 0xbb6   :  { %3011 = vrcp.f32 %v1155_v19 }
 0xbb7   :  { %3013 = vrcp.f32 %v1047_v20 }
 0xbc3   :  { %v3012_v21 = vpop.eup %3011 }
 0xbc4   :  { %vm1159_vm7 = vcmp.gt.f32.partialorder %v3012_v21, 0.5  ;;  %v3014_v25 = vpop.eup %3013  ;;  %v1162_v35 = vmul.f32 %v3012_v21, %v1075_v32 }
 0xbc5   :  { %v2605_v24 = vsel %vm1159_vm7, 1.0, %v3117_v2  ;;  %v1051_v34 = vmul.f32 %v3014_v25, %v3421_v55 }
 0xbc6   :  { %v1291_v28 = vsub.f32 1.0, %v2605_v24 }
 0xc22   :  { %v1165_v22 = vpop.permute.xlu1 %1164 }
 0xc23   :  { %v1167_v23 = vmul.f32 %v3012_v21, %v1165_v22 }
 0xc25   :  { %v1054_v26 = vpop.permute.xlu0 %1053  ;;  %1169 = vrot.lane.b32.xlu1 %v1167_v23, %s3121_s2 }
 0xc26   :  { %v1056_v27 = vmul.f32 %v3014_v25, %v1054_v26 }
 0xc28   :  { %1058 = vrot.lane.b32.xlu0 %v1056_v27, %s3121_s2 }
 0xc29   :  { %1294 = vperm.xlu1 %2945, %v1291_v28  }
 0xc2d   :  { %1181 = vperm.xlu1 %2945, %v2605_v24  }
 0xc97   :  { %v1170_v37 = vpop.permute.xlu1 %1169 }
 0xc98   :  { %v3460_v38 = vadd.f32 %v1170_v37, %v1162_v35 }
 0xc9a   :  { %3015 = vtanh.f32 %v3460_v38  ;;  %v1059_v39 = vpop.permute.xlu0 %1058 }
 0xc9b   :  { %v3464_v41 = vadd.f32 %v1059_v39, %v1051_v34 }
 0xc9d   :  { %3017 = vtanh.f32 %v3464_v41 }
 0xca4   :  { %v1295_v44 = vpop.permute.xlu1 %1294 }
 0xca5   :  { %v1298_v11 = vmul.f32 %v1295_v44, %v3460_v38 }
 0xca7   :  { %v3016_v42 = vpop.eup %3015 }
 0xca8   :  { %1175 = vrot.lane.b32.xlu0 %v3016_v42, %s3122_s28  ;;  %v1182_v47 = vpop.permute.xlu1 %1181 }
 0xcaa   :  { %v3018_v43 = vpop.eup %3017 }
 0xcac   :  { %1064 = vrot.lane.b32.xlu0 %v3018_v43, %s3122_s28 }
 0xd1a   :  { %v1176_v45 = vpop.permute.xlu0 %1175 }
 0xd1b   :  { %v1178_v46 = vmul.f32 %v3012_v21, %v1176_v45  ;;  %v53_v45 = vld [vmem:[%s3739_s5] sm:$0xff] }
 0xd1d   :  { %v1184_v48 = vmul.f32 %v1182_v47, %v1178_v46  ;;  %v1297_v49 = vmul.f32 %v1295_v44, %v1178_v46  ;;  %v54_v44 = vld [vmem:[%s3739_s5 + $0x8] sm:$0xff]  ;;  %v3518_v47 = vld [vmem:[%s3744_s10] ss:$0 sm:$0xff] }
 0xd1e   :  { %v1065_v50 = vpop.permute.xlu0 %1064 }
 0xd1f   :  { %1300 = vrot.lane.b32.xlu1 %v1297_v49, %s3123_s4  ;;  %1186 = vrot.lane.b32.xlu0 %v1184_v48, %s3123_s4  ;;  %v1067_v51 = vmul.f32 %v3014_v25, %v1065_v50 }
 0xd23   :  { %1190 = vrot.lane.b32.xlu1 %v1067_v51, %s3120_s19  ;;  %v2613_v51 = vld [vmem:[%s3740_s6] ss:$0 sm:$0xff] }
 0xd91   :  { %v1301_v52 = vpop.permute.xlu1 %1300  ;;  %v1187_v53 = vpop.permute.xlu0 %1186 }
 0xd92   :  { %2844 = vmatmul.mubr.msk.f32.vlgmr.msra.gmra.mxu1 %vm189_vm3, %v1301_v52  ;;  %v2615_v52 = vld [vmem:[%s3742_s8] ss:$0 sm:$0xff] }
 0xd93   :  { %2847 = vmatpush3.msra.mxu1 %v3250_v29  ;;  %2854 = vmatprep.mubr.msk.f32.mxu1 %vm3118_vm1, %v3117_v2  ;;  %v186_v29 = vadd.f32 %v3362_v36, %v3238_v13 }
 0xd94   :  { %2848 = vmatprep.subr.mxu1 %v3117_v2 }
 0xd95   :  { %v1191_v54 = vpop.permute.xlu1 %1190  ;;  %2849 = vmatpush3.msra.mxu1 %v3255_v30 }
 0xd96   :  { %v1193_v55 = vsel %vm189_vm3, %v1187_v53, %v1191_v54  ;;  %2850 = vmatprep.subr.mxu1 %v3117_v2 }
 0xd97   :  { %2837 = vmatmul.mubr.msk.f32.vlgmr.msra.gmra.mxu0 %vm75_vm0, %v1193_v55  ;;  %2851 = vmatpush3.msra.mxu1 %v3263_v31 }
 0xd98   :  { %2852 = vmatprep.subr.mxu1 %v3117_v2  ;;  %2861 = vmatprep.mubr.msk.f32.mxu0 %vm3118_vm1, %v3117_v2 }
 0xd99   :  { %2853 = vmatpush3.msra.mxu1 %v3272_v33  ;;  %2858 = vmatpush3.msra.mxu0 %v54_v44 }
 0xd9a   :  { %2871 = vmatprep.subr.mxu1 %v3117_v2  ;;  %2859 = vmatprep.subr.mxu0 %v3117_v2 }
 0xd9b   :  { %2860 = vmatpush3.msra.mxu0 %v53_v45 }
 0xd9c   :  { %2864 = vmatprep.subr.mxu0 %v3117_v2 }
 0xe52   :  { %v1370_v30 = vpop.f32.mrf.mxu1 }
 0xe53   :  { %v1374_v56 = vadd.f32 %v1370_v30, %v186_v29 }
 0xe54   :  { %v2845_v57 = vpop.f32.mrf.mxu1 }
 0xe55   :  { %3019 = vtanh.f32 %v1374_v56  ;;  %v2609_v61 = vmul.f32 -1.442695, %v1374_v56 }
 0xe57   :  { %v1263_v58 = vpop.f32.mrf.mxu0 }
 0xe58   :  { %3021 = vtanh.f32 %v1263_v58  ;;  %v2607_v33 = vmul.f32 -1.442695, %v1263_v58 }
 0xe59   :  { %v2838_v59 = vpop.f32.mrf.mxu0  ;;  %3023 = vpow2.f32 %v2609_v61 }
 0xe5a   :  { %3025 = vpow2.f32 %v2607_v33 }
 0xe62   :  { %v3020_v31 = vpop.eup %3019 }
 0xe63   :  { %1387 = vrot.lane.b32.xlu0 %v3020_v31, %s3120_s19 }
 0xe65   :  { %v3022_v60 = vpop.eup %3021 }
 0xe66   :  { %1276 = vrot.lane.b32.xlu1 %v3022_v60, %s3120_s19  ;;  %v3024_v62 = vpop.eup %3023 }
 0xe67   :  { %v3026_v63 = vpop.eup %3025  ;;  %v1378_v13 = vadd.f32 1.0, %v3024_v62  ;;  %v3541_v62 = vld [vmem:[%s3743_s9 + $0x8] sm:$0xff] }
 0xe68   :  { %v1270_v36 = vadd.f32 1.0, %v3026_v63  ;;  %v3546_v63 = vld [vmem:[%s3743_s9] sm:$0xff] }
 0xe69   :  { %3027 = vrcp.f32 %v1378_v13 }
 0xe6a   :  { %3029 = vrcp.f32 %v1270_v36 }
 0xe76   :  { %v3028_v0 = vpop.eup %3027 }
 0xe77   :  { %v3030_v5 = vpop.eup %3029  ;;  %vm1382_vm8 = vcmp.gt.f32.partialorder %v3028_v0, 0.5  ;;  %v1385_v4 = vmul.f32 %v3028_v0, %v1298_v11 }
 0xe78   :  { %v2610_v9 = vsel %vm1382_vm8, 1.0, %v3117_v2  ;;  %v1274_v10 = vmul.f32 %v3030_v5, %v3464_v41 }
 0xed5   :  { %v1388_v1 = vpop.permute.xlu0 %1387 }
 0xed6   :  { %v1390_v3 = vmul.f32 %v3028_v0, %v1388_v1 }
 0xed8   :  { %1392 = vrot.lane.b32.xlu0 %v1390_v3, %s3121_s2  ;;  %v1277_v7 = vpop.permute.xlu1 %1276 }
 0xed9   :  { %v1279_v8 = vmul.f32 %v3030_v5, %v1277_v7 }
 0xedb   :  { %1281 = vrot.lane.b32.xlu1 %v1279_v8, %s3121_s2  ;;  %v1609_v8 = vlaneseq }
 0xedc   :  { %1404 = vperm.xlu0 %2946, %v2610_v9  }
 0xedd   :  { %v3564_v9 = vand.u32 127, %v1609_v8 }
 0xedf   :  { %vm1712_vm9 = vcmp.ge.s32.totalorder %v3564_v9, 48  ;;  %vm1736_vm4 = vcmp.eq.s32.totalorder %v3564_v9, 0  ;;  %vm1942_vm5 = vcmp.eq.s32.totalorder %v3564_v9, 1 }
 0xf4a   :  { %v1393_v12 = vpop.permute.xlu0 %1392 }
 0xf4b   :  { %v1395_v14 = vadd.f32 %v1393_v12, %v1385_v4 }
 0xf4d   :  { %3031 = vtanh.f32 %v1395_v14  ;;  %v1282_v15 = vpop.permute.xlu1 %1281 }
 0xf4e   :  { %v1284_v6 = vadd.f32 %v1282_v15, %v1274_v10  ;;  %v3573_v15 = vadd.s32 4294967248, %v3564_v9 }
 0xf50   :  { %3033 = vtanh.f32 %v1284_v6 }
 0xf57   :  { %v1405_v18 = vpop.permute.xlu0 %1404 }
 0xf5a   :  { %v3032_v16 = vpop.eup %3031 }
 0xf5b   :  { %1398 = vrot.lane.b32.xlu1 %v3032_v16, %s3122_s28 }
 0xf5d   :  { %v3034_v17 = vpop.eup %3033 }
 0xf5e   :  { %1287 = vrot.lane.b32.xlu0 %v3034_v17, %s3122_s28 }
 0xfcd   :  { %v1399_v19 = vpop.permute.xlu1 %1398 }
 0xfce   :  { %v1401_v40 = vmul.f32 %v3028_v0, %v1399_v19 }
 0xfd0   :  { %v1407_v20 = vmul.f32 %v1405_v18, %v1401_v40  ;;  %v1288_v21 = vpop.permute.xlu0 %1287 }
 0xfd1   :  { %v1290_v22 = vmul.f32 %v3030_v5, %v1288_v21 }
 0xfd2   :  { %1409 = vrot.lane.b32.xlu1 %v1407_v20, %s3123_s4 }
 0xfd3   :  { %1413 = vrot.lane.b32.xlu0 %v1290_v22, %s3120_s19 }
0x1044   :  { %v1410_v23 = vpop.permute.xlu1 %1409 }
0x1045   :  { %v1414_v24 = vpop.permute.xlu0 %1413 }
0x1046   :  { %v1416_v25 = vsel %vm189_vm3, %v1410_v23, %v1414_v24  ;;  %v3580_v23 = vld [vmem:[%s3741_s7 + $0x10] sm:$0xf]  ;;  %v3588_v24 = vld [vmem:[%s3741_s7 + $0x8] sm:$0xff] }
0x1047   :  { %2855 = vmatmul.mubr.msk.f32.vlgmr.msra.gmra.mxu1 %vm75_vm0, %v1416_v25  ;;  %v3595_v25 = vld [vmem:[%s3741_s7] sm:$0xff]  ;;  %s3125_s7 = smov [#allocation4]  }
0x1048   :  { %2877 = vmatprep.mubr.msk.f32.mxu1 %vm3118_vm1, %v3117_v2  ;;  %2872 = vmatpush3.msk.msra.mxu1 %vm1745_vm13, %v3580_v23 }
0x1049   :  { %2873 = vmatprep.subr.mxu1 %v3117_v2 }
0x104a   :  { %2874 = vmatpush3.msra.mxu1 %v3588_v24 }
0x104b   :  { %2875 = vmatprep.subr.mxu1 %v3117_v2 }
0x104c   :  { %2876 = vmatpush3.msra.mxu1 %v3595_v25 }
0x104d   :  { %2887 = vmatprep.subr.mxu1 %v3117_v2 }
0x1107   :  { %v1486_v26 = vpop.f32.mrf.mxu1 }
0x1108   :  { %3035 = vtanh.f32 %v1486_v26  ;;  %v2612_v32 = vmul.f32 -1.442695, %v1486_v26 }
0x1109   :  { %v2856_v27 = vpop.f32.mrf.mxu1 }
0x110a   :  { %3037 = vpow2.f32 %v2612_v32 }
0x1115   :  { %v3036_v28 = vpop.eup %3035 }
0x1116   :  { %1499 = vrot.lane.b32.xlu1 %v3036_v28, %s3120_s19 }
0x1117   :  { %v3038_v35 = vpop.eup %3037 }
0x1118   :  { %v1493_v37 = vadd.f32 1.0, %v3038_v35 }
0x111a   :  { %3039 = vrcp.f32 %v1493_v37 }
0x1127   :  { %v3040_v38 = vpop.eup %3039 }
0x1128   :  { %v1497_v41 = vmul.f32 %v3040_v38, %v1284_v6 }
0x1188   :  { %v1500_v34 = vpop.permute.xlu1 %1499 }
0x1189   :  { %v1502_v39 = vmul.f32 %v3040_v38, %v1500_v34 }
0x118b   :  { %1504 = vrot.lane.b32.xlu0 %v1502_v39, %s3121_s2 }
0x11fd   :  { %v1505_v42 = vpop.permute.xlu0 %1504 }
0x11fe   :  { %v1507_v43 = vadd.f32 %v1505_v42, %v1497_v41 }
0x1200   :  { %3041 = vtanh.f32 %v1507_v43 }
0x120d   :  { %v3042_v46 = vpop.eup %3041 }
0x120e   :  { %1510 = vrot.lane.b32.xlu1 %v3042_v46, %s3122_s28 }
0x1212   :  { %1619 = vrot.lane.b32.xlu1 %v3518_v47, %s3120_s19 }
0x1280   :  { %v1511_v48 = vpop.permute.xlu1 %1510 }
0x1281   :  { %v1513_v49 = vmul.f32 %v3040_v38, %v1511_v48 }
0x1283   :  { %1515 = vrot.lane.b32.xlu0 %v1513_v49, %s3123_s4 }
0x1284   :  { %v1620_v59 = vpop.permute.xlu1 %1619 }
0x12f5   :  { %v1516_v50 = vpop.permute.xlu0 %1515 }
0x12f6   :  { %1518 = vst.msk [vmem:[#allocation4] sm:$0xff] %vm189_vm3, %v1516_v50  ;;  %2862 = vmatmul.mubr.msk.f32.vlgmr.msra.gmra.mxu0 %vm189_vm3, %v1516_v50 }
0x12f7   :  { %2868 = vmatprep.mubr.msk.f32.mxu0 %vm3118_vm1, %v3117_v2  ;;  %2865 = vmatpush3.msra.mxu0 %v3541_v62 }
0x12f8   :  { %2866 = vmatprep.subr.mxu0 %v3117_v2 }
0x12f9   :  { %2867 = vmatpush3.msra.mxu0 %v3546_v63 }
0x12fa   :  { %2880 = vmatprep.subr.mxu0 %v3117_v2 }
0x13b6   :  { %v1593_v53 = vpop.f32.mrf.mxu0 }
0x13b7   :  { %v3533_v54 = vadd.f32 %v2613_v51, %v1593_v53 }
0x13b8   :  { %v2863_v55 = vpop.f32.mrf.mxu0 }
0x13b9   :  { %v1611_v29 = vadd.f32 %v2615_v52, %v3533_v54 }
0x13bb   :  { %v1612_v30 = vadd.f32 %v3518_v47, %v1611_v29 }
0x13bd   :  { %v2617_v56 = vmul.f32 -1.442695, %v1612_v30 }
0x13bf   :  { %3043 = vpow2.f32 %v2617_v56 }
0x13cc   :  { %v3044_v57 = vpop.eup %3043 }
0x13cd   :  { %v1616_v58 = vadd.f32 1.0, %v3044_v57 }
0x13cf   :  { %3045 = vrcp.f32 %v1616_v58 }
0x13dc   :  { %v3046_v31 = vpop.eup %3045 }
0x13dd   :  { %v1622_v60 = vmul.f32 %v3046_v31, %v1620_v59  ;;  %v1629_v36 = vsub.f32 1.0, %v3046_v31  ;;  %v1635_v1 = vmul.f32 0.0, %v3046_v31 }
0x13df   :  { %1624 = vrot.lane.b32.xlu0 %v1622_v60, %s3122_s28 }
0x1451   :  { %v1625_v61 = vpop.permute.xlu0 %1624 }
0x1452   :  { %v1627_v33 = vadd.f32 %v1625_v61, %v1611_v29 }
0x1454   :  { %3047 = vtanh.f32 %v1627_v33 }
0x1461   :  { %v3048_v13 = vpop.eup %3047 }
0x1462   :  { %1631 = vrot.lane.b32.xlu1 %v3048_v13, %s3124_s26 }
0x14d4   :  { %v1632_v0 = vpop.permute.xlu1 %1631 }
0x14d5   :  { %v1634_v3 = vmul.f32 %v1632_v0, %v1629_v36 }
0x14d7   :  { %v3553_v5 = vadd.f32 %v1635_v1, %v1634_v3 }
0x14d9   :  { %1638 = vrot.lane.b32.xlu0 %v3553_v5, %s3124_s26 }
0x154b   :  { %v1639_v7 = vpop.permute.xlu0 %1638 }
0x154c   :  { %2869 = vmatmul.mubr.msk.f32.vlgmr.msra.gmra.mxu0 %vm189_vm3, %v1639_v7 }
0x154d   :  { %2881 = vmatpush3.msra.mxu0 %v3541_v62  ;;  %2884 = vmatprep.mubr.msk.f32.mxu0 %vm3118_vm1, %v3117_v2 }
0x154e   :  { %2882 = vmatprep.subr.mxu0 %v3117_v2 }
0x154f   :  { %2883 = vmatpush3.msra.mxu0 %v3546_v63 }
0x1550   :  { %2896 = vmatprep.subr.mxu0 %v3117_v2 }
0x160c   :  { %v1708_v11 = vpop.f32.mrf.mxu0 }
0x160d   :  { %v1709_v4 = vadd.f32 %v3518_v47, %v1708_v11 }
0x160e   :  { %v2870_v12 = vpop.f32.mrf.mxu0 }
0x160f   :  { %v1713_v14 = vsel %vm1712_vm9, %v1709_v4, -inf }
0x1610   :  { %v1715_v10 = vsel %vm1714_vm10, %v1713_v14, -inf }
0x1611   :  { %1716 = vmax.xlane.f32.xlu1 %v1715_v10 }
0x1622   :  { %1828 = vrot.lane.b32.xlu1 %v1709_v4, %s3120_s19 }
0x169a   :  { %v1717_v6 = vpop.xlane.xlu1 %1716 }
0x169b   :  { %vm1718_vm11 = vcmp.ge.f32.partialorder %v1713_v14, %v1717_v6 }
0x169c   :  { %v1720_v16 = vsel %vm1718_vm11, %v3573_v15, 20  ;;  %vm2143_vm11 = vcmp.eq.s32.totalorder %v3564_v9, 2 }
0x169d   :  { %v1721_v17 = vsel %vm1714_vm10, %v1720_v16, 2147483647 }
0x169e   :  { %v1723_v18 = vshra.s32 %v1721_v17, 16  ;;  %v1722_v40 = vand.u32 65535, %v1721_v17  ;;  %v1829_v46 = vpop.permute.xlu1 %1828 }
0x16a0   :  { %v1725_v19 = vcvt.s32.f32 %v1723_v18  ;;  %v1724_v21 = vcvt.s32.f32 %v1722_v40 }
0x16a2   :  { %1726 = vmin.xlane.f32.xlu0 %v1725_v19 }
0x172b   :  { %v1727_v20 = vpop.xlane.xlu0 %1726 }
0x172c   :  { %vm1728_vm12 = vcmp.eq.f32.partialorder %v1725_v19, %v1727_v20  ;;  %v1733_v26 = vcvt.f32.s32 %v1727_v20 }
0x172d   :  { %v1729_v22 = vsel %vm1728_vm12, %v1724_v21, inf }
0x172e   :  { %1730 = vmin.xlane.f32.xlu0 %v1729_v22  ;;  %v1734_v28 = vshll.u32 %v1733_v26, 16 }
0x17b7   :  { %v1731_v27 = vpop.xlane.xlu0 %1730 }
0x17b8   :  { %v1732_v32 = vcvt.f32.s32 %v1731_v27 }
0x17ba   :  { %v3599_v35 = vadd.s32 %v1734_v28, %v1732_v32 }
0x17bc   :  { %vm1738_vm15 = vcmp.eq.s32.totalorder %v3564_v9, %v3599_v35  ;;  %v1737_v10 = vsel %vm1736_vm4, %v3599_v35, 0 }
0x17bd   :  { %v2620_v37 = vsel %vm1738_vm15, 1.0, %v3117_v2  ;;  %vm2344_vm15 = vcmp.eq.s32.totalorder %v3564_v9, 3 }
0x17be   :  { %2878 = vmatmul.mubr.msk.f32.vlgmr.msra.gmra.mxu1 %vm1741_vm14, %v2620_v37 }
0x17bf   :  { %2888 = vmatpush3.msk.msra.mxu1 %vm1745_vm13, %v3580_v23  ;;  %2893 = vmatprep.mubr.msk.f32.mxu1 %vm3118_vm1, %v3117_v2 }
0x17c0   :  { %2889 = vmatprep.subr.mxu1 %v3117_v2 }
0x17c1   :  { %2890 = vmatpush3.msra.mxu1 %v3588_v24 }
0x17c2   :  { %2891 = vmatprep.subr.mxu1 %v3117_v2 }
0x17c3   :  { %2892 = vmatpush3.msra.mxu1 %v3595_v25 }
0x17c4   :  { %2912 = vmatprep.subr.mxu1 %v3117_v2 }
0x187e   :  { %v1815_v38 = vpop.f32.mrf.mxu1 }
0x187f   :  { %v1819_v34 = vadd.f32 %v1815_v38, %v3533_v54 }
0x1880   :  { %v2879_v39 = vpop.f32.mrf.mxu1 }
0x1881   :  { %v1820_v41 = vadd.f32 %v1819_v34, %v1709_v4 }
0x1883   :  { %v2623_v42 = vmul.f32 -1.442695, %v1820_v41 }
0x1885   :  { %3049 = vpow2.f32 %v2623_v42 }
0x1892   :  { %v3050_v43 = vpop.eup %3049 }
0x1893   :  { %v1824_v44 = vadd.f32 1.0, %v3050_v43 }
0x1895   :  { %3051 = vrcp.f32 %v1824_v44 }
0x18a2   :  { %v3052_v45 = vpop.eup %3051 }
0x18a3   :  { %v1831_v48 = vmul.f32 %v3052_v45, %v1829_v46  ;;  %v1838_v52 = vsub.f32 1.0, %v3052_v45  ;;  %v1844_v55 = vmul.f32 %v3052_v45, %v3553_v5 }
0x18a5   :  { %1833 = vrot.lane.b32.xlu0 %v1831_v48, %s3122_s28 }
0x1917   :  { %v1834_v49 = vpop.permute.xlu0 %1833 }
0x1918   :  { %v1836_v50 = vadd.f32 %v1834_v49, %v1819_v34 }
0x191a   :  { %3053 = vtanh.f32 %v1836_v50 }
0x1927   :  { %v3054_v51 = vpop.eup %3053 }
0x1928   :  { %1840 = vrot.lane.b32.xlu1 %v3054_v51, %s3124_s26 }
0x199a   :  { %v1841_v53 = vpop.permute.xlu1 %1840 }
0x199b   :  { %v1843_v29 = vmul.f32 %v1841_v53, %v1838_v52 }
0x199d   :  { %v3618_v30 = vadd.f32 %v1844_v55, %v1843_v29 }
0x199f   :  { %1847 = vrot.lane.b32.xlu1 %v3618_v30, %s3124_s26 }
0x1a11   :  { %v1848_v56 = vpop.permute.xlu1 %1847 }
0x1a12   :  { %2885 = vmatmul.mubr.msk.f32.vlgmr.msra.gmra.mxu0 %vm189_vm3, %v1848_v56 }
0x1a13   :  { %2897 = vmatpush3.msra.mxu0 %v3541_v62  ;;  %2900 = vmatprep.mubr.msk.f32.mxu0 %vm3118_vm1, %v3117_v2 }
0x1a14   :  { %2898 = vmatprep.subr.mxu0 %v3117_v2 }
0x1a15   :  { %2899 = vmatpush3.msra.mxu0 %v3546_v63 }
0x1a16   :  { %2903 = vmatprep.subr.mxu0 %v3117_v2 }
0x1ad2   :  { %v1917_v57 = vpop.f32.mrf.mxu0 }
0x1ad3   :  { %v1918_v58 = vadd.f32 %v3518_v47, %v1917_v57 }
0x1ad4   :  { %v2886_v59 = vpop.f32.mrf.mxu0 }
0x1ad5   :  { %v1921_v31 = vsel %vm1712_vm9, %v1918_v58, -inf }
0x1ad6   :  { %v1922_v60 = vsel %vm1714_vm10, %v1921_v31, -inf }
0x1ad7   :  { %1923 = vmax.xlane.f32.xlu0 %v1922_v60 }
0x1b60   :  { %v1924_v61 = vpop.xlane.xlu0 %1923 }
0x1b61   :  { %vm1925_vm0 = vcmp.ge.f32.partialorder %v1921_v31, %v1924_v61 }
0x1b62   :  { %v1926_v33 = vsel %vm1925_vm0, %v3573_v15, 20 }
0x1b63   :  { %v1927_v13 = vsel %vm1714_vm10, %v1926_v33, 2147483647 }
0x1b64   :  { %v1929_v36 = vshra.s32 %v1927_v13, 16  ;;  %v1928_v1 = vand.u32 65535, %v1927_v13 }
0x1b66   :  { %v1931_v0 = vcvt.s32.f32 %v1929_v36  ;;  %v1930_v5 = vcvt.s32.f32 %v1928_v1 }
0x1b68   :  { %1932 = vmin.xlane.f32.xlu1 %v1931_v0 }
0x1bf1   :  { %v1933_v3 = vpop.xlane.xlu1 %1932 }
0x1bf2   :  { %vm1934_vm2 = vcmp.eq.f32.partialorder %v1931_v0, %v1933_v3  ;;  %v1939_v8 = vcvt.f32.s32 %v1933_v3 }
0x1bf3   :  { %v1935_v7 = vsel %vm1934_vm2, %v1930_v5, inf }
0x1bf4   :  { %1936 = vmin.xlane.f32.xlu0 %v1935_v7  ;;  %v1940_v4 = vshll.u32 %v1939_v8, 16 }
0x1c0a   :  { %2029 = vrot.lane.b32.xlu0 %v1918_v58, %s3120_s19 }
0x1c7d   :  { %v1937_v11 = vpop.xlane.xlu0 %1936 }
0x1c7e   :  { %v1938_v12 = vcvt.f32.s32 %v1937_v11 }
0x1c80   :  { %v1941_v14 = vadd.s32 %v1940_v4, %v1938_v12 }
0x1c81   :  { %v2030_v27 = vpop.permute.xlu0 %2029 }
0x1c82   :  { %v3639_v6 = vsel %vm1942_vm5, %v1941_v14, %v1737_v10  ;;  %vm1944_vm6 = vcmp.eq.s32.totalorder %v3564_v9, %v1941_v14 }
0x1c83   :  { %v2625_v16 = vsel %vm1944_vm6, 1.0, %v3117_v2 }
0x1c84   :  { %2894 = vmatmul.mubr.msk.f32.vlgmr.msra.gmra.mxu1 %vm1741_vm14, %v2625_v16 }
0x1c85   :  { %2913 = vmatpush3.msra.mxu1 %v3541_v62  ;;  %2916 = vmatprep.mubr.msk.f32.mxu1 %vm3118_vm1, %v3117_v2 }
0x1c86   :  { %2914 = vmatprep.subr.mxu1 %v3117_v2 }
0x1c87   :  { %2915 = vmatpush3.msra.mxu1 %v3546_v63 }
0x1c88   :  { %2919 = vmatprep.subr.mxu1 %v3117_v2 }
0x1d44   :  { %v2016_v17 = vpop.f32.mrf.mxu1 }
0x1d45   :  { %v2020_v18 = vadd.f32 %v2016_v17, %v3533_v54 }
0x1d46   :  { %v2895_v19 = vpop.f32.mrf.mxu1 }
0x1d47   :  { %v2021_v40 = vadd.f32 %v2020_v18, %v1918_v58 }
0x1d49   :  { %v2628_v20 = vmul.f32 -1.442695, %v2021_v40 }
0x1d4b   :  { %3055 = vpow2.f32 %v2628_v20 }
0x1d58   :  { %v3056_v21 = vpop.eup %3055 }
0x1d59   :  { %v2025_v22 = vadd.f32 1.0, %v3056_v21 }
0x1d5b   :  { %3057 = vrcp.f32 %v2025_v22 }
0x1d68   :  { %v3058_v26 = vpop.eup %3057 }
0x1d69   :  { %v2032_v28 = vmul.f32 %v3058_v26, %v2030_v27  ;;  %v2039_v38 = vsub.f32 1.0, %v3058_v26  ;;  %v2045_v39 = vmul.f32 %v3058_v26, %v3618_v30 }
0x1d6b   :  { %2034 = vrot.lane.b32.xlu1 %v2032_v28, %s3122_s28 }
0x1ddd   :  { %v2035_v32 = vpop.permute.xlu1 %2034 }
0x1dde   :  { %v2037_v35 = vadd.f32 %v2035_v32, %v2020_v18 }
0x1de0   :  { %3059 = vtanh.f32 %v2037_v35 }
0x1ded   :  { %v3060_v37 = vpop.eup %3059 }
0x1dee   :  { %2041 = vrot.lane.b32.xlu1 %v3060_v37, %s3124_s26 }
0x1e60   :  { %v2042_v34 = vpop.permute.xlu1 %2041 }
0x1e61   :  { %v2044_v41 = vmul.f32 %v2042_v34, %v2039_v38 }
0x1e63   :  { %v3654_v42 = vadd.f32 %v2045_v39, %v2044_v41 }
0x1e65   :  { %2048 = vrot.lane.b32.xlu0 %v3654_v42, %s3124_s26 }
0x1ed7   :  { %v2049_v43 = vpop.permute.xlu0 %2048 }
0x1ed8   :  { %2901 = vmatmul.mubr.msk.f32.vlgmr.msra.gmra.mxu0 %vm189_vm3, %v2049_v43 }
0x1ed9   :  { %2904 = vmatpush3.msk.msra.mxu0 %vm1745_vm13, %v3580_v23  ;;  %2909 = vmatprep.mubr.msk.f32.mxu0 %vm3118_vm1, %v3117_v2 }
0x1eda   :  { %2905 = vmatprep.subr.mxu0 %v3117_v2 }
0x1edb   :  { %2906 = vmatpush3.msra.mxu0 %v3588_v24 }
0x1edc   :  { %2907 = vmatprep.subr.mxu0 %v3117_v2 }
0x1edd   :  { %2908 = vmatpush3.msra.mxu0 %v3595_v25 }
0x1ede   :  { %2928 = vmatprep.subr.mxu0 %v3117_v2 }
0x1f98   :  { %v2118_v44 = vpop.f32.mrf.mxu0 }
0x1f99   :  { %v2119_v45 = vadd.f32 %v3518_v47, %v2118_v44 }
0x1f9a   :  { %v2902_v46 = vpop.f32.mrf.mxu0 }
0x1f9b   :  { %v2122_v48 = vsel %vm1712_vm9, %v2119_v45, -inf }
0x1f9c   :  { %v2123_v49 = vsel %vm1714_vm10, %v2122_v48, -inf }
0x1f9d   :  { %2124 = vmax.xlane.f32.xlu1 %v2123_v49 }
0x1fae   :  { %2230 = vrot.lane.b32.xlu1 %v2119_v45, %s3120_s19 }
0x2026   :  { %v2125_v50 = vpop.xlane.xlu1 %2124 }
0x2027   :  { %vm2126_vm7 = vcmp.ge.f32.partialorder %v2122_v48, %v2125_v50 }
0x2028   :  { %v2127_v51 = vsel %vm2126_vm7, %v3573_v15, 20 }
0x2029   :  { %v2128_v52 = vsel %vm1714_vm10, %v2127_v51, 2147483647 }
0x202a   :  { %v2130_v53 = vshra.s32 %v2128_v52, 16  ;;  %v2129_v29 = vand.u32 65535, %v2128_v52  ;;  %v2231_v4 = vpop.permute.xlu1 %2230 }
0x202c   :  { %v2132_v55 = vcvt.s32.f32 %v2130_v53  ;;  %v2131_v56 = vcvt.s32.f32 %v2129_v29 }
0x202e   :  { %2133 = vmin.xlane.f32.xlu0 %v2132_v55 }
0x20b7   :  { %v2134_v30 = vpop.xlane.xlu0 %2133 }
0x20b8   :  { %vm2135_vm8 = vcmp.eq.f32.partialorder %v2132_v55, %v2134_v30  ;;  %v2140_v58 = vcvt.f32.s32 %v2134_v30 }
0x20b9   :  { %v2136_v57 = vsel %vm2135_vm8, %v2131_v56, inf }
0x20ba   :  { %2137 = vmin.xlane.f32.xlu0 %v2136_v57  ;;  %v2141_v31 = vshll.u32 %v2140_v58, 16 }
0x2143   :  { %v2138_v59 = vpop.xlane.xlu0 %2137 }
0x2144   :  { %v2139_v60 = vcvt.f32.s32 %v2138_v59 }
0x2146   :  { %v2142_v61 = vadd.s32 %v2141_v31, %v2139_v60 }
0x2148   :  { %vm2145_vm12 = vcmp.eq.s32.totalorder %v3564_v9, %v2142_v61  ;;  %v3678_v33 = vsel %vm2143_vm11, %v2142_v61, %v3639_v6 }
0x2149   :  { %v2630_v13 = vsel %vm2145_vm12, 1.0, %v3117_v2 }
0x214a   :  { %2910 = vmatmul.mubr.msk.f32.vlgmr.msra.gmra.mxu0 %vm1741_vm14, %v2630_v13 }
0x214b   :  { %2929 = vmatpush3.msra.mxu0 %v3541_v62  ;;  %2932 = vmatprep.mubr.msk.f32.mxu0 %vm3118_vm1, %v3117_v2 }
0x214c   :  { %2930 = vmatprep.subr.mxu0 %v3117_v2 }
0x214d   :  { %2931 = vmatpush3.msra.mxu0 %v3546_v63 }
0x220a   :  { %v2217_v36 = vpop.f32.mrf.mxu0 }
0x220b   :  { %v2221_v0 = vadd.f32 %v2217_v36, %v3533_v54 }
0x220c   :  { %v2911_v1 = vpop.f32.mrf.mxu0 }
0x220d   :  { %v2222_v3 = vadd.f32 %v2221_v0, %v2119_v45 }
0x220f   :  { %v2633_v5 = vmul.f32 -1.442695, %v2222_v3 }
0x2211   :  { %3061 = vpow2.f32 %v2633_v5 }
0x221e   :  { %v3062_v7 = vpop.eup %3061 }
0x221f   :  { %v2226_v8 = vadd.f32 1.0, %v3062_v7 }
0x2221   :  { %3063 = vrcp.f32 %v2226_v8 }
0x222e   :  { %v3064_v11 = vpop.eup %3063 }
0x222f   :  { %v2233_v62 = vmul.f32 %v3064_v11, %v2231_v4  ;;  %v2240_v63 = vsub.f32 1.0, %v3064_v11  ;;  %v2246_v16 = vmul.f32 %v3064_v11, %v3654_v42 }
0x2231   :  { %2235 = vrot.lane.b32.xlu0 %v2233_v62, %s3122_s28 }
0x22a3   :  { %v2236_v12 = vpop.permute.xlu0 %2235 }
0x22a4   :  { %v2238_v14 = vadd.f32 %v2236_v12, %v2221_v0 }
0x22a6   :  { %3065 = vtanh.f32 %v2238_v14 }
0x22b3   :  { %v3066_v10 = vpop.eup %3065 }
0x22b4   :  { %2242 = vrot.lane.b32.xlu1 %v3066_v10, %s3124_s26 }
0x2326   :  { %v2243_v6 = vpop.permute.xlu1 %2242 }
0x2327   :  { %v2245_v17 = vmul.f32 %v2243_v6, %v2240_v63 }
0x2329   :  { %v2247_v18 = vadd.f32 %v2246_v16, %v2245_v17 }
0x232b   :  { %2249 = vrot.lane.b32.xlu1 %v2247_v18, %s3124_s26 }
0x239d   :  { %v2250_v19 = vpop.permute.xlu1 %2249 }
0x239e   :  { %2917 = vmatmul.mubr.msk.f32.vlgmr.msra.gmra.mxu1 %vm189_vm3, %v2250_v19 }
0x239f   :  { %2920 = vmatpush3.msk.msra.mxu1 %vm1745_vm13, %v3580_v23  ;;  %2925 = vmatprep.mubr.msk.f32.mxu1 %vm3118_vm1, %v3117_v2 }
0x23a0   :  { %2921 = vmatprep.subr.mxu1 %v3117_v2 }
0x23a1   :  { %2922 = vmatpush3.msra.mxu1 %v3588_v24 }
0x23a2   :  { %2923 = vmatprep.subr.mxu1 %v3117_v2 }
0x23a3   :  { %2924 = vmatpush3.msra.mxu1 %v3595_v25 }
0x245e   :  { %v2319_v40 = vpop.f32.mrf.mxu1 }
0x245f   :  { %v2320_v20 = vadd.f32 %v3518_v47, %v2319_v40 }
0x2460   :  { %v2918_v21 = vpop.f32.mrf.mxu1 }
0x2461   :  { %v2323_v22 = vsel %vm1712_vm9, %v2320_v20, -inf }
0x2462   :  { %v2324_v23 = vsel %vm1714_vm10, %v2323_v22, -inf }
0x2463   :  { %2325 = vmax.xlane.f32.xlu0 %v2324_v23 }
0x24ec   :  { %v2326_v26 = vpop.xlane.xlu0 %2325 }
0x24ed   :  { %vm2327_vm1 = vcmp.ge.f32.partialorder %v2323_v22, %v2326_v26 }
0x24ee   :  { %v2328_v27 = vsel %vm2327_vm1, %v3573_v15, 20 }
0x24ef   :  { %v2329_v24 = vsel %vm1714_vm10, %v2328_v27, 2147483647 }
0x24f0   :  { %v2331_v28 = vshra.s32 %v2329_v24, 16  ;;  %v2330_v25 = vand.u32 65535, %v2329_v24 }
0x24f2   :  { %v2333_v32 = vcvt.s32.f32 %v2331_v28  ;;  %v2332_v37 = vcvt.s32.f32 %v2330_v25 }
0x24f4   :  { %2334 = vmin.xlane.f32.xlu1 %v2333_v32 }
0x257d   :  { %v2335_v35 = vpop.xlane.xlu1 %2334 }
0x257e   :  { %vm2336_vm13 = vcmp.eq.f32.partialorder %v2333_v32, %v2335_v35  ;;  %v2341_v34 = vcvt.f32.s32 %v2335_v35 }
0x257f   :  { %v2337_v38 = vsel %vm2336_vm13, %v2332_v37, inf }
0x2580   :  { %2338 = vmin.xlane.f32.xlu0 %v2337_v38  ;;  %v2342_v41 = vshll.u32 %v2341_v34, 16 }
0x2596   :  { %2431 = vrot.lane.b32.xlu0 %v2320_v20, %s3120_s19  ;;  %s2565_s19 = sshll.u32 %s3125_s7, 4  ;;  %s2566_s19 = int_to_ptr.vmem [resolvable:$true] %s2565_s19 }
0x2597   :  { %p3078_p1 = scmp.lt.s32.totalorder %s2566_s19, %s2566_s19 }
0x2609   :  { %v2339_v39 = vpop.xlane.xlu0 %2338 }
0x260a   :  { %v2340_v42 = vcvt.f32.s32 %v2339_v39 }
0x260c   :  { %v2343_v43 = vadd.s32 %v2342_v41, %v2340_v42 }
0x260d   :  { %v2432_v29 = vpop.permute.xlu0 %2431 }
0x260e   :  { %vm2346_vm0 = vcmp.eq.s32.totalorder %v3564_v9, %v2343_v43  ;;  %v3711_v44 = vsel %vm2344_vm15, %v2343_v43, %v3678_v33 }
0x260f   :  { %v2635_v45 = vsel %vm2346_vm0, 1.0, %v3117_v2 }
0x2610   :  { %2926 = vmatmul.mubr.msk.f32.vlgmr.msra.gmra.mxu1 %vm1741_vm14, %v2635_v45 }
0x26d0   :  { %v2418_v46 = vpop.f32.mrf.mxu1 }
0x26d1   :  { %v2422_v48 = vadd.f32 %v2418_v46, %v3533_v54 }
0x26d2   :  { %v2927_v49 = vpop.f32.mrf.mxu1 }
0x26d3   :  { %v2423_v50 = vadd.f32 %v2422_v48, %v2320_v20 }
0x26d5   :  { %v2638_v51 = vmul.f32 -1.442695, %v2423_v50 }
0x26d7   :  { %3067 = vpow2.f32 %v2638_v51 }
0x26e4   :  { %v3068_v52 = vpop.eup %3067 }
0x26e5   :  { %v2427_v53 = vadd.f32 1.0, %v3068_v52 }
0x26e7   :  { %3069 = vrcp.f32 %v2427_v53 }
0x26f4   :  { %v3070_v55 = vpop.eup %3069 }
0x26f5   :  { %v2434_v30 = vmul.f32 %v3070_v55, %v2432_v29  ;;  %v2441_v58 = vsub.f32 1.0, %v3070_v55  ;;  %v2447_v59 = vmul.f32 %v3070_v55, %v2247_v18 }
0x26f7   :  { %2436 = vrot.lane.b32.xlu1 %v2434_v30, %s3122_s28  ;;  %s3073_s28 = scalar_lea.vmem %s2566_s19, 128 }
0x26f8   :  { %p3074_p0 = scmp.ne.s32.totalorder %s2566_s19, %s3073_s28  ;;  %p3079_p2 = scmp.lt.s32.totalorder %s3073_s28, %s3073_s28 }
0x26fa   :  { %p3080_p3 = por %p3079_p2, %p3078_p1 }
0x26fc   :  { %p3081_p4 = pnand %p3080_p3, %p3074_p0 }
0x2769   :  { %v2437_v56 = vpop.permute.xlu1 %2436 }
0x276a   :  { %v2439_v57 = vadd.f32 %v2437_v56, %v2422_v48 }
0x276c   :  { %3071 = vtanh.f32 %v2439_v57 }
0x2779   :  { %v3072_v2 = vpop.eup %3071 }
0x277a   :  { %2443 = vrot.lane.b32.xlu1 %v3072_v2, %s3124_s26 }
0x27ec   :  { %v2444_v54 = vpop.permute.xlu1 %2443 }
0x27ed   :  { %v2446_v31 = vmul.f32 %v2444_v54, %v2441_v58 }
0x27ef   :  { %v2448_v60 = vadd.f32 %v2447_v59, %v2446_v31 }
0x27f1   :  { %2450 = vrot.lane.b32.xlu0 %v2448_v60, %s3124_s26 }
0x2863   :  { %v2451_v61 = vpop.permute.xlu0 %2450 }
0x2864   :  { %2933 = vmatmul.mubr.msk.f32.vlgmr.msra.gmra.mxu0 %vm189_vm3, %v2451_v61 }
0x2924   :  { %v2520_v33 = vpop.f32.mrf.mxu0 }
0x2925   :  { %v2521_v13 = vadd.f32 %v3518_v47, %v2520_v33 }
0x2926   :  { %v2934_v36 = vpop.f32.mrf.mxu0 }
0x2927   :  { %v2524_v0 = vsel %vm1712_vm9, %v2521_v13, -inf }
0x2928   :  { %v2525_v1 = vsel %vm1714_vm10, %v2524_v0, -inf }
0x2929   :  { %2526 = vmax.xlane.f32.xlu1 %v2525_v1 }
0x29b2   :  { %v2527_v3 = vpop.xlane.xlu1 %2526 }
0x29b3   :  { %vm2528_vm14 = vcmp.ge.f32.partialorder %v2524_v0, %v2527_v3 }
0x29b4   :  { %v2529_v5 = vsel %vm2528_vm14, %v3573_v15, 20 }
0x29b5   :  { %v2530_v7 = vsel %vm1714_vm10, %v2529_v5, 2147483647 }
0x29b6   :  { %v2532_v8 = vshra.s32 %v2530_v7, 16  ;;  %v2531_v4 = vand.u32 65535, %v2530_v7 }
0x29b8   :  { %v2534_v11 = vcvt.s32.f32 %v2532_v8  ;;  %v2533_v12 = vcvt.s32.f32 %v2531_v4 }
0x29ba   :  { %2535 = vmin.xlane.f32.xlu0 %v2534_v11 }
0x2a43   :  { %v2536_v62 = vpop.xlane.xlu0 %2535 }
0x2a44   :  { %vm2537_vm3 = vcmp.eq.f32.partialorder %v2534_v11, %v2536_v62 }
0x2a45   :  { %v2538_v47 = vsel %vm2537_vm3, %v2533_v12, inf }
0x2a46   :  { %2539 = vmin.xlane.f32.xlu0 %v2538_v47 }
0x2a47   :  { %3084 = shalt.err (!%p3081_p4)
}
0x2a48   :  { %2568 = dma.vmem_to_hbm [thread:$0]  %s2566_s19, 128, %s3746_s12, [#allocation5]   ;;  %v2542_v15 = vcvt.f32.s32 %v2536_v62  ;;  %vm2545_vm9 = vcmp.eq.s32.totalorder %v3564_v9, 4  ;;  %vm2547_vm10 = vcmask 39936  }
0x2a49   :  { %s3126_s16 = smov [#allocation2]  }
0x2a4a   :  { %v2543_v10 = vshll.u32 %v2542_v15, 16  ;;  %s2555_s17 = sshll.u32 %s3126_s16, 4  ;;  %s2556_s17 = int_to_ptr.vmem [resolvable:$true] %s2555_s17 }
0x2a4b   :  { %s3093_s18 = scalar_lea.vmem %s2556_s17, 128  ;;  %p3098_p6 = scmp.lt.s32.totalorder %s2556_s17, %s2556_s17 }
0x2a4c   :  { %p3094_p5 = scmp.ne.s32.totalorder %s2556_s17, %s3093_s18  ;;  %p3099_p7 = scmp.lt.s32.totalorder %s3093_s18, %s3093_s18 }
0x2a4e   :  { %p3100_p8 = por %p3099_p7, %p3098_p6 }
0x2a50   :  { %p3101_p9 = pnand %p3100_p8, %p3094_p5 }
0x2acf   :  { %v2540_v14 = vpop.xlane.xlu0 %2539 }
0x2ad0   :  { %v2541_v63 = vcvt.f32.s32 %v2540_v14 }
0x2ad2   :  { %v2544_v6 = vadd.s32 %v2543_v10, %v2541_v63 }
0x2ad4   :  { %v2546_v16 = vsel %vm2545_vm9, %v2544_v6, %v3711_v44 }
0x2ad5   :  { %2548 = vst.msk [vmem:[#allocation2] sm:$0xff] %vm2547_vm10, %v2546_v16 }
0x2ad6   :  { %3104 = shalt.err (!%p3101_p9)
}
0x2ad7   :  { %2558 = dma.vmem_to_hbm [thread:$0]  %s2556_s17, 128, %s3745_s11, [#allocation3]  }
0x2ad8   :  { %3113 = dma.done.wait [#allocation3], 128  }
0x2ad9   :  { %3114 = vsyncadd [#allocation3], 4294967168 }
0x2ada   :  { %3115 = dma.done.wait [#allocation5], 128  }
0x2adb   :  { %3116 = vsyncadd [#allocation5], 4294967168 }
0x2adc   :  { %2575 = vsyncpa [#allocation3], 1 }
0x2add   :  { %2576 = vsyncpa [#allocation5], 1 }

</bundles_post_ra>
